<compile_context>
chip_gen: v7x
topology: tpu7x:2x2x1
jax: 0.10.0
libtpu: 0.0.40
codegen_flags: <defaults>
</compile_context>

<pallas_src>
import functools

import jax
import jax.numpy as jnp
from jax import lax
from jax.experimental import pallas as pl
from jax.experimental.pallas import tpu as pltpu


_NEG_BIG = -1e9           # bias for padded vocab columns: exp() underflows to 0


def _round_up(x, m):
    return (x + m - 1) // m * m


def _pad_to(a, shape, fill=0):
    pads = [(0, s - d) for d, s in zip(a.shape, shape)]
    return jnp.pad(a, pads, constant_values=fill)


def _pad_gates(w, hid, hid_p, in_p):
    """(in, 3*hid) -> (in_p, 3*hid_p); zero-pad each r/z/n gate block separately."""
    parts = []
    for g in range(3):
        blk = w[:, g * hid:(g + 1) * hid]
        parts.append(jnp.pad(blk, ((0, in_p - w.shape[0]), (0, hid_p - hid))))
    return jnp.concatenate(parts, axis=1)


def _vmem_limit_bytes():
    try:
        cap = int(pltpu.get_tpu_info().vmem_capacity_bytes)
    except Exception:
        cap = 64 * 1024 * 1024          # conservative fallback (safe on v7x too)
    return min(cap * 3 // 4, 100 * 1024 * 1024)


# ------------------------- kernel A: GRU recurrence ---------------------------
def _gru_recurrence_kernel(ses_ref, x_ref,
                           w1_ref, b1_ref, wih_ref, whh_ref, bih_ref, bhh_ref,
                           hs_ref,
                           h_sc, gx_sc,
                           *, hid_p, t_block, ng):
    """Grid (row_group, t_block): serial GRU over all fused rows of one group."""
    Hp = hid_p
    f32 = jnp.float32
    cdt = w1_ref.dtype                      # MXU operand dtype (f32 or bf16)

    # h0 = tanh(lin1(ses_encoding)) for this row group, once at the first T block.
    @pl.when(pl.program_id(1) == 0)
    def _():
        h_sc[...] = jnp.tanh(
            jnp.dot(ses_ref[...], w1_ref[...], preferred_element_type=f32)
            + b1_ref[...])

    # Input-to-hidden projection for this whole T block in one MXU matmul
    # (amortized over t_block serial steps; next block's x DMA overlaps it).
    gx_sc[...] = jnp.dot(x_ref[...], wih_ref[...],
                         preferred_element_type=f32) + bih_ref[...]   # (TB*Ng, 3Hp)

    whh = whh_ref[...]
    bhh = bhh_ref[...]

    def step(i, h):
        row = pl.multiple_of(i * ng, ng)
        gx = gx_sc[pl.ds(row, ng), :]                                  # (Ng, 3Hp)
        gh = jnp.dot(h.astype(cdt), whh,
                     preferred_element_type=f32) + bhh                # (Ng, 3Hp)
        r = jax.nn.sigmoid(gx[:, :Hp] + gh[:, :Hp])
        z = jax.nn.sigmoid(gx[:, Hp:2 * Hp] + gh[:, Hp:2 * Hp])
        n = jnp.tanh(gx[:, 2 * Hp:] + r * gh[:, 2 * Hp:])
        h_new = n + z * (h - n)                                        # (Ng, Hp) f32
        hs_ref[pl.ds(row, ng), :] = h_new.astype(hs_ref.dtype)
        return h_new

    h_sc[...] = lax.fori_loop(0, t_block, step, h_sc[...], unroll=True)


# ------------------- kernel B: V-tiled projection + NLL -----------------------
def _nll_epilogue_kernel(hs_ref, tgt_ref, wt_ref, w2_ref, b2_ref,
                         loss_ref,
                         m_sc, l_sc, p_sc,
                         *, v_block):
    """Grid (row_block, v_block): online log-sum-exp + masked target gather."""
    f32 = jnp.float32
    v = pl.program_id(1)
    nv = pl.num_programs(1)

    @pl.when(v == 0)
    def _():
        m_sc[...] = jnp.full_like(m_sc, -jnp.inf)
        l_sc[...] = jnp.zeros_like(l_sc)
        p_sc[...] = jnp.zeros_like(p_sc)

    logits = jnp.dot(hs_ref[...], w2_ref[...],
                     preferred_element_type=f32) + b2_ref[...]         # (RB, VB)

    # Online softmax statistics across V tiles.
    m_prev = m_sc[...]
    m_new = jnp.maximum(m_prev, jnp.max(logits, axis=-1, keepdims=True))
    alpha = jnp.exp(m_prev - m_new)
    l_sc[...] = alpha * l_sc[...] + jnp.sum(jnp.exp(logits - m_new),
                                            axis=-1, keepdims=True)
    m_sc[...] = m_new

    # Running masked gather of the raw target logit (no one-hot, no logp tensor).
    col = lax.broadcasted_iota(jnp.int32, logits.shape, 1) + v * v_block
    p_sc[...] = p_sc[...] + jnp.sum(jnp.where(col == tgt_ref[...], logits, 0.0),
                                    axis=-1, keepdims=True)

    @pl.when(v == nv - 1)
    def _():
        lse = m_sc[...] + jnp.log(l_sc[...])
        # wt carries 1/B_chunk and zeros for padded rows / timesteps.
        loss_ref[0, 0, 0] = -jnp.sum(wt_ref[...] * (p_sc[...] - lse))


# ---------------------------------- wrapper -----------------------------------
def decoder_teacher_forcing_loss(params, ses_encoding, inp_batches,
                                 matmul_dtype=jnp.bfloat16,
                                 num_row_groups=1, t_block=4, v_block=None):
    """ses_encoding: (total_B, 1, ses_hid) f32; inp_batches: list of (B, T) int32.

    num_row_groups: set 2 on v7x (two TensorCores); 1 on v5e/v6e.
    """
    vocab, emb = params["embed"].shape
    ses_hid, hid = params["w1"].shape
    f32 = jnp.float32

    C = len(inp_batches)
    G = num_row_groups
    assert C % G == 0, "num_row_groups must divide len(inp_batches)"
    Cg = C // G

    # Lane / sublane aligned sizes.
    Bp = _round_up(max(x.shape[0] for x in inp_batches), 8)
    Tm = max(x.shape[1] for x in inp_batches)
    TB = t_block
    Tp = _round_up(Tm, TB)
    Ep = _round_up(emb, 128)
    Sp = _round_up(ses_hid, 128)
    Hp = _round_up(hid, 128)
    Vp = _round_up(vocab, 128)
    if v_block is None:
        v_block = next(vb for vb in (512, 384, 256, 128) if Vp % vb == 0)
    VB = v_block
    assert Vp % VB == 0 and VB % 128 == 0

    Ng = Cg * Bp                     # fused rows per group
    N = G * Ng                       # total fused batch rows
    num_t_blocks = Tp // TB
    RB = TB * Ng                     # epilogue row-block (matches hs layout blocks)
    num_row_blocks = G * num_t_blocks
    total_rows = num_row_blocks * RB          # == G * Tp * Ng

    # ---- pad parameters once (zero pads keep the GRU math bit-exact) --------
    w1 = _pad_to(params["w1"], (Sp, Hp)).astype(matmul_dtype)
    b1 = _pad_to(params["b1"], (1, Hp)).astype(f32)
    w_ih = _pad_gates(params["w_ih"], hid, Hp, Ep).astype(matmul_dtype)
    w_hh = _pad_gates(params["w_hh"], hid, Hp, Hp).astype(matmul_dtype)
    b_ih = _pad_gates(params["b_ih"], hid, Hp, 1).astype(f32)
    b_hh = _pad_gates(params["b_hh"], hid, Hp, 1).astype(f32)
    w2 = _pad_to(params["w2"], (Hp, Vp)).astype(matmul_dtype)
    b2 = _pad_to(params["b2"], (1, Vp), fill=_NEG_BIG).astype(f32)   # pad cols die
    embed = _pad_to(params["embed"], (vocab, Ep)).astype(f32)

    # ---- build fused-row inputs ---------------------------------------------
    # Row layout: r = (g*Tp + t) * Ng + (chunk_within_group*Bp + b)
    ses_list, xemb_list, tgt_list, wt_list = [], [], [], []
    c = 0
    for x in inp_batches:
        B, T = x.shape
        ses = ses_encoding[c:c + B, 0, :]
        ses_list.append(_pad_to(ses, (Bp, Sp)))
        xe = jnp.take(embed, x, axis=0)                 # (B, T, Ep)
        xe = jnp.transpose(xe, (1, 0, 2))               # (T, B, Ep)
        xemb_list.append(_pad_to(xe, (Tp, Bp, Ep)))
        tgt_list.append(_pad_to(x.T.astype(jnp.int32), (Tp, Bp)))
        wt = jnp.full((T, B), 1.0 / B, f32)             # 1/B_chunk, zero on padding
        wt_list.append(_pad_to(wt, (Tp, Bp)))
        c += B

    def fuse_rows(per_chunk, trailing):
        a = jnp.stack(per_chunk)                                  # (C, Tp, Bp, *tr)
        a = a.reshape((G, Cg, Tp, Bp) + trailing)
        a = jnp.moveaxis(a, 2, 1)                                 # (G, Tp, Cg, Bp, *tr)
        return a.reshape((total_rows,) + trailing)

    x_all = fuse_rows(xemb_list, (Ep,)).astype(matmul_dtype)      # (rows, Ep)
    tgt_all = fuse_rows(tgt_list, ()).reshape(total_rows, 1)      # (rows, 1) i32
    wt_all = fuse_rows(wt_list, ()).reshape(total_rows, 1)        # (rows, 1) f32
    ses_all = jnp.stack(ses_list).reshape(N, Sp).astype(matmul_dtype)   # (N, Sp)

    vmem_limit = _vmem_limit_bytes()

    # ---- kernel A: serial recurrence, streams x in / hs out per T block -----
    rec_kernel = functools.partial(_gru_recurrence_kernel,
                                   hid_p=Hp, t_block=TB, ng=Ng)
    hs = pl.pallas_call(
        rec_kernel,
        out_shape=jax.ShapeDtypeStruct((total_rows, Hp), matmul_dtype),
        grid=(G, num_t_blocks),
        in_specs=[
            pl.BlockSpec((Ng, Sp), lambda g, t: (g, 0)),
            pl.BlockSpec((TB * Ng, Ep), lambda g, t: (g * num_t_blocks + t, 0)),
            pl.BlockSpec((Sp, Hp), lambda g, t: (0, 0)),
            pl.BlockSpec((1, Hp), lambda g, t: (0, 0)),
            pl.BlockSpec((Ep, 3 * Hp), lambda g, t: (0, 0)),
            pl.BlockSpec((Hp, 3 * Hp), lambda g, t: (0, 0)),
            pl.BlockSpec((1, 3 * Hp), lambda g, t: (0, 0)),
            pl.BlockSpec((1, 3 * Hp), lambda g, t: (0, 0)),
        ],
        out_specs=pl.BlockSpec((TB * Ng, Hp), lambda g, t: (g * num_t_blocks + t, 0)),
        scratch_shapes=[
            pltpu.VMEM((Ng, Hp), f32),            # loop-carried hidden state (f32)
            pltpu.VMEM((TB * Ng, 3 * Hp), f32),   # per-T-block input gates
        ],
        compiler_params=pltpu.CompilerParams(
            dimension_semantics=("parallel", "arbitrary"),
            vmem_limit_bytes=vmem_limit),
    )(ses_all, x_all, w1, b1, w_ih, w_hh, b_ih, b_hh)

    # ---- kernel B: V-tiled output projection + online LSE + NLL -------------
    loss_kernel = functools.partial(_nll_epilogue_kernel, v_block=VB)
    losses = pl.pallas_call(
        loss_kernel,
        out_shape=jax.ShapeDtypeStruct((num_row_blocks, 1, 1), f32),
        grid=(num_row_blocks, Vp // VB),
        in_specs=[
            pl.BlockSpec((RB, Hp), lambda r, v: (r, 0)),
            pl.BlockSpec((RB, 1), lambda r, v: (r, 0)),
            pl.BlockSpec((RB, 1), lambda r, v: (r, 0)),
            pl.BlockSpec((Hp, VB), lambda r, v: (0, v)),
            pl.BlockSpec((1, VB), lambda r, v: (0, v)),
        ],
        out_specs=pl.BlockSpec((1, 1, 1), lambda r, v: (r, 0, 0)),
        scratch_shapes=[pltpu.VMEM((RB, 1), f32),     # running max
                        pltpu.VMEM((RB, 1), f32),     # running sum-exp
                        pltpu.VMEM((RB, 1), f32)],    # running target logit
        compiler_params=pltpu.CompilerParams(
            dimension_semantics=("parallel", "arbitrary"),
            vmem_limit_bytes=vmem_limit),
    )(hs, tgt_all, wt_all, w2, b2)

    return jnp.sum(losses)


# ---------------------------- pure-JAX reference ------------------------------
def reference_loss(params, ses_encoding, inp_batches):
    hid = params["w1"].shape[1]
    total = jnp.float32(0.0)
    c = 0
    for x in inp_batches:
        B, T = x.shape
        ses = ses_encoding[c:c + B, 0, :]
        h = jnp.tanh(ses @ params["w1"] + params["b1"][0])
        x_emb = jnp.take(params["embed"], x, axis=0)
        for t in range(T):
            gx = x_emb[:, t, :] @ params["w_ih"] + params["b_ih"][0]
            gh = h @ params["w_hh"] + params["b_hh"][0]
            r = jax.nn.sigmoid(gx[:, :hid] + gh[:, :hid])
            z = jax.nn.sigmoid(gx[:, hid:2 * hid] + gh[:, hid:2 * hid])
            n = jnp.tanh(gx[:, 2 * hid:] + r * gh[:, 2 * hid:])
            h = (1.0 - z) * n + z * h
            logits = h @ params["w2"] + params["b2"][0]
            logp = jax.nn.log_softmax(logits, axis=-1)
            total = total + (-jnp.mean(logp[jnp.arange(B), x[:, t]]))
        c += B
    return total


# ------------------------------------ main ------------------------------------
if __name__ == "__main__":
    vocab_size, emb_size, ses_hid_size, hid_size = 200, 16, 24, 32

    key = jax.random.PRNGKey(0)
    ks = jax.random.split(key, 12)

    params = {
        "embed": jax.random.normal(ks[0], (vocab_size, emb_size), jnp.float32) * 0.1,
        "w1":    jax.random.normal(ks[1], (ses_hid_size, hid_size), jnp.float32) * 0.1,
        "b1":    jax.random.normal(ks[2], (1, hid_size), jnp.float32) * 0.1,
        "w_ih":  jax.random.normal(ks[3], (emb_size, 3 * hid_size), jnp.float32) * 0.1,
        "w_hh":  jax.random.normal(ks[4], (hid_size, 3 * hid_size), jnp.float32) * 0.1,
        "b_ih":  jax.random.normal(ks[5], (1, 3 * hid_size), jnp.float32) * 0.1,
        "b_hh":  jax.random.normal(ks[6], (1, 3 * hid_size), jnp.float32) * 0.1,
        "w2":    jax.random.normal(ks[7], (hid_size, vocab_size), jnp.float32) * 0.1,
        "b2":    jax.random.normal(ks[8], (1, vocab_size), jnp.float32) * 0.1,
    }

    # Two chunks with different batch sizes / sequence lengths (exercises padding).
    inp_batches = [
        jax.random.randint(ks[10], (2, 7), 0, vocab_size, jnp.int32),
        jax.random.randint(ks[11], (3, 5), 0, vocab_size, jnp.int32),
    ]
    total_B = sum(x.shape[0] for x in inp_batches)
    ses_encoding = jax.random.normal(ks[9], (total_B, 1, ses_hid_size), jnp.float32)

    ref = jax.block_until_ready(reference_loss(params, ses_encoding, inp_batches))

    # f32 MXU operands, single row group (v5e/v6e configuration).
    loss_f32 = jax.block_until_ready(
        decoder_teacher_forcing_loss(params, ses_encoding, inp_batches,
                                     matmul_dtype=jnp.float32,
                                     num_row_groups=1, v_block=128))
    assert jnp.allclose(loss_f32, ref, rtol=1e-3, atol=1e-2), (loss_f32, ref)

    # f32, two row groups (v7x configuration: rows split across TensorCores).
    loss_f32_g2 = jax.block_until_ready(
        decoder_teacher_forcing_loss(params, ses_encoding, inp_batches,
                                     matmul_dtype=jnp.float32,
                                     num_row_groups=2, v_block=128))
    assert jnp.allclose(loss_f32_g2, ref, rtol=1e-3, atol=1e-2), (loss_f32_g2, ref)

    # bf16 MXU operands with f32 accumulation (recommended on all generations).
    loss_bf16 = jax.block_until_ready(
        decoder_teacher_forcing_loss(params, ses_encoding, inp_batches,
                                     matmul_dtype=jnp.bfloat16,
                                     num_row_groups=1))
    assert jnp.allclose(loss_bf16, ref, rtol=2e-2, atol=2e-1), (loss_bf16, ref)

    print("KERNEL_OK")
</pallas_src>

<mosaic_0001>
module attributes {stable_mosaic.version = 11 : i64} {
  func.func @_gru_recurrence_kernel(%arg0: i32, %arg1: i32, %arg2: memref<16x128xf32, #tpu.memory_space<vmem>>, %arg3: memref<64x128xf32, #tpu.memory_space<vmem>>, %arg4: memref<128x128xf32, #tpu.memory_space<vmem>>, %arg5: memref<1x128xf32, #tpu.memory_space<vmem>>, %arg6: memref<128x384xf32, #tpu.memory_space<vmem>>, %arg7: memref<128x384xf32, #tpu.memory_space<vmem>>, %arg8: memref<1x384xf32, #tpu.memory_space<vmem>>, %arg9: memref<1x384xf32, #tpu.memory_space<vmem>>, %arg10: memref<64x128xf32, #tpu.memory_space<vmem>>, %arg11: memref<16x128xf32, #tpu.memory_space<vmem>>, %arg12: memref<64x384xf32, #tpu.memory_space<vmem>>) attributes {dimension_semantics = [#tpu.dimension_semantics<parallel>, #tpu.dimension_semantics<arbitrary>], iteration_bounds = array<i64: 1, 2>, scalar_prefetch = 0 : i64, scratch_operands = 2 : i64, tpu.core_type = #tpu.core_type<tc>, window_params = [{transform_indices = @transform_0, window_bounds = array<i64: 16, 128>}, {transform_indices = @transform_1, window_bounds = array<i64: 64, 128>}, {pipeline_mode = #tpu.pipeline_mode<synchronous>, transform_indices = @transform_2, window_bounds = array<i64: 128, 128>}, {pipeline_mode = #tpu.pipeline_mode<synchronous>, transform_indices = @transform_3, window_bounds = array<i64: 1, 128>}, {pipeline_mode = #tpu.pipeline_mode<synchronous>, transform_indices = @transform_4, window_bounds = array<i64: 128, 384>}, {pipeline_mode = #tpu.pipeline_mode<synchronous>, transform_indices = @transform_5, window_bounds = array<i64: 128, 384>}, {pipeline_mode = #tpu.pipeline_mode<synchronous>, transform_indices = @transform_6, window_bounds = array<i64: 1, 384>}, {pipeline_mode = #tpu.pipeline_mode<synchronous>, transform_indices = @transform_7, window_bounds = array<i64: 1, 384>}, {transform_indices = @transform_8, window_bounds = array<i64: 64, 128>}]} {
    %c0_i32 = arith.constant 0 : i32
    %0 = arith.cmpi eq, %arg1, %c0_i32 : i32
    %1 = arith.extui %0 : i1 to i32
    %c0_i32_0 = arith.constant 0 : i32
    %2 = arith.cmpi ne, %1, %c0_i32_0 : i32
    scf.if %2 {
      %c0_40 = arith.constant 0 : index
      %c0_41 = arith.constant 0 : index
      %146 = vector.load %arg2[%c0_40, %c0_41] : memref<16x128xf32, #tpu.memory_space<vmem>>, vector<16x128xf32>
      %c0_42 = arith.constant 0 : index
      %c0_43 = arith.constant 0 : index
      %147 = vector.load %arg4[%c0_42, %c0_43] : memref<128x128xf32, #tpu.memory_space<vmem>>, vector<128x128xf32>
      %cst_44 = arith.constant dense<0.000000e+00> : vector<16x128xf32>
      %148 = tpu.matmul %146, %147, %cst_44 {dimension_numbers = #tpu.dot_dimension_numbers<[1], [0], [0], [1], [0, 0, 1, 1], [], []>} : vector<16x128xf32>, vector<128x128xf32>, vector<16x128xf32> -> vector<16x128xf32>
      %c0_45 = arith.constant 0 : index
      %c0_46 = arith.constant 0 : index
      %149 = vector.load %arg5[%c0_45, %c0_46] : memref<1x128xf32, #tpu.memory_space<vmem>>, vector<1x128xf32>
      %150 = vector.broadcast %149 : vector<1x128xf32> to vector<16x128xf32>
      %151 = arith.addf %148, %150 : vector<16x128xf32>
      %152 = math.tanh %151 : vector<16x128xf32>
      %c0_47 = arith.constant 0 : index
      %c0_48 = arith.constant 0 : index
      %153 = vector.load %arg11[%c0_47, %c0_48] : memref<16x128xf32, #tpu.memory_space<vmem>>, vector<16x128xf32>
      tpu.vector_store %arg11[%c0_47, %c0_48], %152 {strides = array<i32>} : memref<16x128xf32, #tpu.memory_space<vmem>>, vector<16x128xf32>,
    } else {
    }
    %c0 = arith.constant 0 : index
    %c0_1 = arith.constant 0 : index
    %3 = vector.load %arg3[%c0, %c0_1] : memref<64x128xf32, #tpu.memory_space<vmem>>, vector<64x128xf32>
    %c0_2 = arith.constant 0 : index
    %c0_3 = arith.constant 0 : index
    %4 = vector.load %arg6[%c0_2, %c0_3] : memref<128x384xf32, #tpu.memory_space<vmem>>, vector<128x384xf32>
    %cst = arith.constant dense<0.000000e+00> : vector<64x384xf32>
    %5 = tpu.matmul %3, %4, %cst {dimension_numbers = #tpu.dot_dimension_numbers<[1], [0], [0], [1], [0, 0, 1, 1], [], []>} : vector<64x128xf32>, vector<128x384xf32>, vector<64x384xf32> -> vector<64x384xf32>
    %c0_4 = arith.constant 0 : index
    %c0_5 = arith.constant 0 : index
    %6 = vector.load %arg8[%c0_4, %c0_5] : memref<1x384xf32, #tpu.memory_space<vmem>>, vector<1x384xf32>
    %7 = vector.broadcast %6 : vector<1x384xf32> to vector<64x384xf32>
    %8 = arith.addf %5, %7 : vector<64x384xf32>
    %c0_6 = arith.constant 0 : index
    %c0_7 = arith.constant 0 : index
    %9 = vector.load %arg12[%c0_6, %c0_7] : memref<64x384xf32, #tpu.memory_space<vmem>>, vector<64x384xf32>
    tpu.vector_store %arg12[%c0_6, %c0_7], %8 {strides = array<i32>} : memref<64x384xf32, #tpu.memory_space<vmem>>, vector<64x384xf32>,
    %c0_8 = arith.constant 0 : index
    %c0_9 = arith.constant 0 : index
    %10 = vector.load %arg7[%c0_8, %c0_9] : memref<128x384xf32, #tpu.memory_space<vmem>>, vector<128x384xf32>
    %c0_10 = arith.constant 0 : index
    %c0_11 = arith.constant 0 : index
    %11 = vector.load %arg9[%c0_10, %c0_11] : memref<1x384xf32, #tpu.memory_space<vmem>>, vector<1x384xf32>
    %c0_12 = arith.constant 0 : index
    %c0_13 = arith.constant 0 : index
    %12 = vector.load %arg11[%c0_12, %c0_13] : memref<16x128xf32, #tpu.memory_space<vmem>>, vector<16x128xf32>
    %c0_i32_14 = arith.constant 0 : i32
    %c16_i32 = arith.constant 16 : i32
    %13 = arith.muli %c0_i32_14, %c16_i32 : i32
    %14 = tpu.assume_multiple %13, 16 : i32
    %15 = arith.index_cast %14 : i32 to index
    %c0_15 = arith.constant 0 : index
    %16 = vector.load %arg12[%15, %c0_15] : memref<64x384xf32, #tpu.memory_space<vmem>>, vector<16x384xf32>
    %cst_16 = arith.constant dense<0.000000e+00> : vector<16x384xf32>
    %17 = tpu.matmul %12, %10, %cst_16 {dimension_numbers = #tpu.dot_dimension_numbers<[1], [0], [0], [1], [0, 0, 1, 1], [], []>} : vector<16x128xf32>, vector<128x384xf32>, vector<16x384xf32> -> vector<16x384xf32>
    %18 = vector.broadcast %11 : vector<1x384xf32> to vector<16x384xf32>
    %19 = arith.addf %17, %18 : vector<16x384xf32>
    %20 = vector.extract_strided_slice %16 {offsets = [0, 0], sizes = [16, 128], strides = [1, 1]} : vector<16x384xf32> to vector<16x128xf32>
    %21 = vector.extract_strided_slice %19 {offsets = [0, 0], sizes = [16, 128], strides = [1, 1]} : vector<16x384xf32> to vector<16x128xf32>
    %22 = arith.addf %20, %21 : vector<16x128xf32>
    %23 = arith.negf %22 : vector<16x128xf32>
    %24 = math.exp %23 : vector<16x128xf32>
    %cst_17 = arith.constant 1.000000e+00 : f32
    %25 = vector.broadcast %cst_17 : f32 to vector<16x128xf32>
    %26 = arith.addf %25, %24 : vector<16x128xf32>
    %27 = arith.divf %25, %26 : vector<16x128xf32>
    %28 = vector.extract_strided_slice %16 {offsets = [0, 128], sizes = [16, 128], strides = [1, 1]} : vector<16x384xf32> to vector<16x128xf32>
    %29 = vector.extract_strided_slice %19 {offsets = [0, 128], sizes = [16, 128], strides = [1, 1]} : vector<16x384xf32> to vector<16x128xf32>
    %30 = arith.addf %28, %29 : vector<16x128xf32>
    %31 = arith.negf %30 : vector<16x128xf32>
    %32 = math.exp %31 : vector<16x128xf32>
    %cst_18 = arith.constant 1.000000e+00 : f32
    %33 = vector.broadcast %cst_18 : f32 to vector<16x128xf32>
    %34 = arith.addf %33, %32 : vector<16x128xf32>
    %35 = arith.divf %33, %34 : vector<16x128xf32>
    %36 = vector.extract_strided_slice %16 {offsets = [0, 256], sizes = [16, 128], strides = [1, 1]} : vector<16x384xf32> to vector<16x128xf32>
    %37 = vector.extract_strided_slice %19 {offsets = [0, 256], sizes = [16, 128], strides = [1, 1]} : vector<16x384xf32> to vector<16x128xf32>
    %38 = arith.mulf %27, %37 : vector<16x128xf32>
    %39 = arith.addf %36, %38 : vector<16x128xf32>
    %40 = math.tanh %39 : vector<16x128xf32>
    %41 = arith.subf %12, %40 : vector<16x128xf32>
    %42 = arith.mulf %35, %41 : vector<16x128xf32>
    %43 = arith.addf %40, %42 : vector<16x128xf32>
    %44 = arith.index_cast %14 : i32 to index
    %c0_19 = arith.constant 0 : index
    %45 = vector.load %arg10[%44, %c0_19] : memref<64x128xf32, #tpu.memory_space<vmem>>, vector<16x128xf32>
    tpu.vector_store %arg10[%44, %c0_19], %43 {strides = array<i32>} : memref<64x128xf32, #tpu.memory_space<vmem>>, vector<16x128xf32>,
    %c1_i32 = arith.constant 1 : i32
    %c16_i32_20 = arith.constant 16 : i32
    %46 = arith.muli %c1_i32, %c16_i32_20 : i32
    %47 = tpu.assume_multiple %46, 16 : i32
    %48 = arith.index_cast %47 : i32 to index
    %c0_21 = arith.constant 0 : index
    %49 = vector.load %arg12[%48, %c0_21] : memref<64x384xf32, #tpu.memory_space<vmem>>, vector<16x384xf32>
    %cst_22 = arith.constant dense<0.000000e+00> : vector<16x384xf32>
    %50 = tpu.matmul %43, %10, %cst_22 {dimension_numbers = #tpu.dot_dimension_numbers<[1], [0], [0], [1], [0, 0, 1, 1], [], []>} : vector<16x128xf32>, vector<128x384xf32>, vector<16x384xf32> -> vector<16x384xf32>
    %51 = vector.broadcast %11 : vector<1x384xf32> to vector<16x384xf32>
    %52 = arith.addf %50, %51 : vector<16x384xf32>
    %53 = vector.extract_strided_slice %49 {offsets = [0, 0], sizes = [16, 128], strides = [1, 1]} : vector<16x384xf32> to vector<16x128xf32>
    %54 = vector.extract_strided_slice %52 {offsets = [0, 0], sizes = [16, 128], strides = [1, 1]} : vector<16x384xf32> to vector<16x128xf32>
    %55 = arith.addf %53, %54 : vector<16x128xf32>
    %56 = arith.negf %55 : vector<16x128xf32>
    %57 = math.exp %56 : vector<16x128xf32>
    %cst_23 = arith.constant 1.000000e+00 : f32
    %58 = vector.broadcast %cst_23 : f32 to vector<16x128xf32>
    %59 = arith.addf %58, %57 : vector<16x128xf32>
    %60 = arith.divf %58, %59 : vector<16x128xf32>
    %61 = vector.extract_strided_slice %49 {offsets = [0, 128], sizes = [16, 128], strides = [1, 1]} : vector<16x384xf32> to vector<16x128xf32>
    %62 = vector.extract_strided_slice %52 {offsets = [0, 128], sizes = [16, 128], strides = [1, 1]} : vector<16x384xf32> to vector<16x128xf32>
    %63 = arith.addf %61, %62 : vector<16x128xf32>
    %64 = arith.negf %63 : vector<16x128xf32>
    %65 = math.exp %64 : vector<16x128xf32>
    %cst_24 = arith.constant 1.000000e+00 : f32
    %66 = vector.broadcast %cst_24 : f32 to vector<16x128xf32>
    %67 = arith.addf %66, %65 : vector<16x128xf32>
    %68 = arith.divf %66, %67 : vector<16x128xf32>
    %69 = vector.extract_strided_slice %49 {offsets = [0, 256], sizes = [16, 128], strides = [1, 1]} : vector<16x384xf32> to vector<16x128xf32>
    %70 = vector.extract_strided_slice %52 {offsets = [0, 256], sizes = [16, 128], strides = [1, 1]} : vector<16x384xf32> to vector<16x128xf32>
    %71 = arith.mulf %60, %70 : vector<16x128xf32>
    %72 = arith.addf %69, %71 : vector<16x128xf32>
    %73 = math.tanh %72 : vector<16x128xf32>
    %74 = arith.subf %43, %73 : vector<16x128xf32>
    %75 = arith.mulf %68, %74 : vector<16x128xf32>
    %76 = arith.addf %73, %75 : vector<16x128xf32>
    %77 = arith.index_cast %47 : i32 to index
    %c0_25 = arith.constant 0 : index
    %78 = vector.load %arg10[%77, %c0_25] : memref<64x128xf32, #tpu.memory_space<vmem>>, vector<16x128xf32>
    tpu.vector_store %arg10[%77, %c0_25], %76 {strides = array<i32>} : memref<64x128xf32, #tpu.memory_space<vmem>>, vector<16x128xf32>,
    %c2_i32 = arith.constant 2 : i32
    %c16_i32_26 = arith.constant 16 : i32
    %79 = arith.muli %c2_i32, %c16_i32_26 : i32
    %80 = tpu.assume_multiple %79, 16 : i32
    %81 = arith.index_cast %80 : i32 to index
    %c0_27 = arith.constant 0 : index
    %82 = vector.load %arg12[%81, %c0_27] : memref<64x384xf32, #tpu.memory_space<vmem>>, vector<16x384xf32>
    %cst_28 = arith.constant dense<0.000000e+00> : vector<16x384xf32>
    %83 = tpu.matmul %76, %10, %cst_28 {dimension_numbers = #tpu.dot_dimension_numbers<[1], [0], [0], [1], [0, 0, 1, 1], [], []>} : vector<16x128xf32>, vector<128x384xf32>, vector<16x384xf32> -> vector<16x384xf32>
    %84 = vector.broadcast %11 : vector<1x384xf32> to vector<16x384xf32>
    %85 = arith.addf %83, %84 : vector<16x384xf32>
    %86 = vector.extract_strided_slice %82 {offsets = [0, 0], sizes = [16, 128], strides = [1, 1]} : vector<16x384xf32> to vector<16x128xf32>
    %87 = vector.extract_strided_slice %85 {offsets = [0, 0], sizes = [16, 128], strides = [1, 1]} : vector<16x384xf32> to vector<16x128xf32>
    %88 = arith.addf %86, %87 : vector<16x128xf32>
    %89 = arith.negf %88 : vector<16x128xf32>
    %90 = math.exp %89 : vector<16x128xf32>
    %cst_29 = arith.constant 1.000000e+00 : f32
    %91 = vector.broadcast %cst_29 : f32 to vector<16x128xf32>
    %92 = arith.addf %91, %90 : vector<16x128xf32>
    %93 = arith.divf %91, %92 : vector<16x128xf32>
    %94 = vector.extract_strided_slice %82 {offsets = [0, 128], sizes = [16, 128], strides = [1, 1]} : vector<16x384xf32> to vector<16x128xf32>
    %95 = vector.extract_strided_slice %85 {offsets = [0, 128], sizes = [16, 128], strides = [1, 1]} : vector<16x384xf32> to vector<16x128xf32>
    %96 = arith.addf %94, %95 : vector<16x128xf32>
    %97 = arith.negf %96 : vector<16x128xf32>
    %98 = math.exp %97 : vector<16x128xf32>
    %cst_30 = arith.constant 1.000000e+00 : f32
    %99 = vector.broadcast %cst_30 : f32 to vector<16x128xf32>
    %100 = arith.addf %99, %98 : vector<16x128xf32>
    %101 = arith.divf %99, %100 : vector<16x128xf32>
    %102 = vector.extract_strided_slice %82 {offsets = [0, 256], sizes = [16, 128], strides = [1, 1]} : vector<16x384xf32> to vector<16x128xf32>
    %103 = vector.extract_strided_slice %85 {offsets = [0, 256], sizes = [16, 128], strides = [1, 1]} : vector<16x384xf32> to vector<16x128xf32>
    %104 = arith.mulf %93, %103 : vector<16x128xf32>
    %105 = arith.addf %102, %104 : vector<16x128xf32>
    %106 = math.tanh %105 : vector<16x128xf32>
    %107 = arith.subf %76, %106 : vector<16x128xf32>
    %108 = arith.mulf %101, %107 : vector<16x128xf32>
    %109 = arith.addf %106, %108 : vector<16x128xf32>
    %110 = arith.index_cast %80 : i32 to index
    %c0_31 = arith.constant 0 : index
    %111 = vector.load %arg10[%110, %c0_31] : memref<64x128xf32, #tpu.memory_space<vmem>>, vector<16x128xf32>
    tpu.vector_store %arg10[%110, %c0_31], %109 {strides = array<i32>} : memref<64x128xf32, #tpu.memory_space<vmem>>, vector<16x128xf32>,
    %c3_i32 = arith.constant 3 : i32
    %c16_i32_32 = arith.constant 16 : i32
    %112 = arith.muli %c3_i32, %c16_i32_32 : i32
    %113 = tpu.assume_multiple %112, 16 : i32
    %114 = arith.index_cast %113 : i32 to index
    %c0_33 = arith.constant 0 : index
    %115 = vector.load %arg12[%114, %c0_33] : memref<64x384xf32, #tpu.memory_space<vmem>>, vector<16x384xf32>
    %cst_34 = arith.constant dense<0.000000e+00> : vector<16x384xf32>
    %116 = tpu.matmul %109, %10, %cst_34 {dimension_numbers = #tpu.dot_dimension_numbers<[1], [0], [0], [1], [0, 0, 1, 1], [], []>} : vector<16x128xf32>, vector<128x384xf32>, vector<16x384xf32> -> vector<16x384xf32>
    %117 = vector.broadcast %11 : vector<1x384xf32> to vector<16x384xf32>
    %118 = arith.addf %116, %117 : vector<16x384xf32>
    %119 = vector.extract_strided_slice %115 {offsets = [0, 0], sizes = [16, 128], strides = [1, 1]} : vector<16x384xf32> to vector<16x128xf32>
    %120 = vector.extract_strided_slice %118 {offsets = [0, 0], sizes = [16, 128], strides = [1, 1]} : vector<16x384xf32> to vector<16x128xf32>
    %121 = arith.addf %119, %120 : vector<16x128xf32>
    %122 = arith.negf %121 : vector<16x128xf32>
    %123 = math.exp %122 : vector<16x128xf32>
    %cst_35 = arith.constant 1.000000e+00 : f32
    %124 = vector.broadcast %cst_35 : f32 to vector<16x128xf32>
    %125 = arith.addf %124, %123 : vector<16x128xf32>
    %126 = arith.divf %124, %125 : vector<16x128xf32>
    %127 = vector.extract_strided_slice %115 {offsets = [0, 128], sizes = [16, 128], strides = [1, 1]} : vector<16x384xf32> to vector<16x128xf32>
    %128 = vector.extract_strided_slice %118 {offsets = [0, 128], sizes = [16, 128], strides = [1, 1]} : vector<16x384xf32> to vector<16x128xf32>
    %129 = arith.addf %127, %128 : vector<16x128xf32>
    %130 = arith.negf %129 : vector<16x128xf32>
    %131 = math.exp %130 : vector<16x128xf32>
    %cst_36 = arith.constant 1.000000e+00 : f32
    %132 = vector.broadcast %cst_36 : f32 to vector<16x128xf32>
    %133 = arith.addf %132, %131 : vector<16x128xf32>
    %134 = arith.divf %132, %133 : vector<16x128xf32>
    %135 = vector.extract_strided_slice %115 {offsets = [0, 256], sizes = [16, 128], strides = [1, 1]} : vector<16x384xf32> to vector<16x128xf32>
    %136 = vector.extract_strided_slice %118 {offsets = [0, 256], sizes = [16, 128], strides = [1, 1]} : vector<16x384xf32> to vector<16x128xf32>
    %137 = arith.mulf %126, %136 : vector<16x128xf32>
    %138 = arith.addf %135, %137 : vector<16x128xf32>
    %139 = math.tanh %138 : vector<16x128xf32>
    %140 = arith.subf %109, %139 : vector<16x128xf32>
    %141 = arith.mulf %134, %140 : vector<16x128xf32>
    %142 = arith.addf %139, %141 : vector<16x128xf32>
    %143 = arith.index_cast %113 : i32 to index
    %c0_37 = arith.constant 0 : index
    %144 = vector.load %arg10[%143, %c0_37] : memref<64x128xf32, #tpu.memory_space<vmem>>, vector<16x128xf32>
    tpu.vector_store %arg10[%143, %c0_37], %142 {strides = array<i32>} : memref<64x128xf32, #tpu.memory_space<vmem>>, vector<16x128xf32>,
    %c4_i32 = arith.constant 4 : i32
    %c0_38 = arith.constant 0 : index
    %c0_39 = arith.constant 0 : index
    %145 = vector.load %arg11[%c0_38, %c0_39] : memref<16x128xf32, #tpu.memory_space<vmem>>, vector<16x128xf32>
    tpu.vector_store %arg11[%c0_38, %c0_39], %142 {strides = array<i32>} : memref<16x128xf32, #tpu.memory_space<vmem>>, vector<16x128xf32>,
    return
  }
  func.func @transform_0(%arg0: i32, %arg1: i32) -> (i32, i32) {
    %c0_i32 = arith.constant 0 : i32
    %c0_i32_0 = arith.constant 0 : i32
    return %arg0, %c0_i32 : i32, i32
  }
  func.func @transform_1(%arg0: i32, %arg1: i32) -> (i32, i32) {
    %c2_i32 = arith.constant 2 : i32
    %0 = arith.muli %arg0, %c2_i32 : i32
    %1 = arith.addi %0, %arg1 : i32
    %c0_i32 = arith.constant 0 : i32
    %c0_i32_0 = arith.constant 0 : i32
    return %1, %c0_i32 : i32, i32
  }
  func.func @transform_2(%arg0: i32, %arg1: i32) -> (i32, i32) {
    %c0_i32 = arith.constant 0 : i32
    %c0_i32_0 = arith.constant 0 : i32
    %c0_i32_1 = arith.constant 0 : i32
    return %c0_i32, %c0_i32_0 : i32, i32
  }
  func.func @transform_3(%arg0: i32, %arg1: i32) -> (i32, i32) {
    %c0_i32 = arith.constant 0 : i32
    %c0_i32_0 = arith.constant 0 : i32
    %c0_i32_1 = arith.constant 0 : i32
    return %c0_i32, %c0_i32_0 : i32, i32
  }
  func.func @transform_4(%arg0: i32, %arg1: i32) -> (i32, i32) {
    %c0_i32 = arith.constant 0 : i32
    %c0_i32_0 = arith.constant 0 : i32
    %c0_i32_1 = arith.constant 0 : i32
    return %c0_i32, %c0_i32_0 : i32, i32
  }
  func.func @transform_5(%arg0: i32, %arg1: i32) -> (i32, i32) {
    %c0_i32 = arith.constant 0 : i32
    %c0_i32_0 = arith.constant 0 : i32
    %c0_i32_1 = arith.constant 0 : i32
    return %c0_i32, %c0_i32_0 : i32, i32
  }
  func.func @transform_6(%arg0: i32, %arg1: i32) -> (i32, i32) {
    %c0_i32 = arith.constant 0 : i32
    %c0_i32_0 = arith.constant 0 : i32
    %c0_i32_1 = arith.constant 0 : i32
    return %c0_i32, %c0_i32_0 : i32, i32
  }
  func.func @transform_7(%arg0: i32, %arg1: i32) -> (i32, i32) {
    %c0_i32 = arith.constant 0 : i32
    %c0_i32_0 = arith.constant 0 : i32
    %c0_i32_1 = arith.constant 0 : i32
    return %c0_i32, %c0_i32_0 : i32, i32
  }
  func.func @transform_8(%arg0: i32, %arg1: i32) -> (i32, i32) {
    %c2_i32 = arith.constant 2 : i32
    %0 = arith.muli %arg0, %c2_i32 : i32
    %1 = arith.addi %0, %arg1 : i32
    %c0_i32 = arith.constant 0 : i32
    %c0_i32_0 = arith.constant 0 : i32
    return %1, %c0_i32 : i32, i32
  }
}

</mosaic_0001>

<bundles_post_ra>
// kernel: tpu_custom_call.1
= control target key start
LH: loop header
LB: loop body
LE: loop exit
PB: predicated region body
PF: predicated region fallthrough
CT: control target
= control target key end

     0   :  { %s3756_s0 = inlined_call_operand.hbm [shape: f32[16,128], index: 0, kind: input, shape index: {}]   ;;  %s3757_s1 = inlined_call_operand.hbm [shape: f32[128,128], index: 1, kind: input, shape index: {}]   ;;  %s3758_s2 = inlined_call_operand.hbm [shape: f32[128,128], index: 2, kind: input, shape index: {}]   ;;  %s3759_s3 = inlined_call_operand.vmem [shape: f32[1,128], index: 3, kind: input, shape index: {}]   ;;  %s3760_s4 = inlined_call_operand.hbm [shape: f32[128,384], index: 4, kind: input, shape index: {}]   ;;  %s3761_s5 = inlined_call_operand.hbm [shape: f32[128,384], index: 5, kind: input, shape index: {}]   ;;  %s3762_s6 = inlined_call_operand.vmem [shape: f32[1,384], index: 6, kind: input, shape index: {}]   ;;  %s3763_s7 = inlined_call_operand.vmem [shape: f32[1,384], index: 7, kind: input, shape index: {}]   ;;  %s3764_s8 = inlined_call_operand.hbm [shape: f32[128,128], index: 8, kind: output, shape index: {}]  }
   0x1   :  { %3777 = sst [smem:[#allocation21_spill]] %s3756_s0 }
   0x2   :  { %3778 = sst [smem:[#allocation22_spill]] %s3758_s2 }
   0x3   :  { %3779 = sst [smem:[#allocation23_spill]] %s3760_s4 }
   0x4   :  { %3780 = sst [smem:[#allocation24_spill]] %s3764_s8 }
   0x5   :  { %13 = vsyncpa [#allocation5], 0 }
   0x6   :  { %14 = vsyncpa [#allocation8], 0 }
   0x7   :  { %16 = vsyncpa [#allocation8 + $0x1], 0 }
   0x8   :  { %17 = vsyncpa [#allocation11], 0 }
   0x9   :  { %18 = vsyncpa [#allocation6], 0 }
   0xa   :  { %20 = vsyncpa [#allocation6 + $0x1], 0  ;;  %s3144_s27 = smov 0   ;;  %s3146_s28 = smov 0  }
   0xb   :  { %s3148_s29 = smov 0   ;;  %s3150_s30 = smov 0  }
   0xc   :  { %s3152_s9 = smov 0   ;;  %s3154_s10 = smov 0  }
   0xd LB: > { %3781 = sst [smem:[#allocation19_spill]] %s3064_s27  ;;  %s3175_s11 = sadd.s32 4294967295, %s3084_s10   ;;  %s3084_s10 = sphi %s3154_s10, %s26_s10   ;;  %s3080_s9 = sphi %s3152_s9, %s3815_s9   ;;  %s3076_s30 = sphi %s3150_s30, %s3814_s30   ;;  %s3072_s29 = sphi %s3148_s29, %s3813_s29   ;;  %s3068_s28 = sphi %s3146_s28, %s3812_s28   ;;  %s3064_s27 = sphi %s3144_s27, %s3811_s27  }
   0xe   : > { %s1873_s12 = sadd.s32 4294967294, %s3084_s10   ;;  %p88_p0 = scmp.ne.s32.totalorder %s3068_s28, %s3064_s27 }
   0xf   : > { %p3765_p1 = scmp.eq.s32.totalorder %s3175_s11, 0  ;;  %p248_p3 = scmp.eq.s32.totalorder %s1873_s12, 1 }
  0x10   : > { %p1874_p5 = scmp.ge.s32.totalorder %s3084_s10, 1  ;;  %p255_p7 = scmp.lt.s32.totalorder %s3084_s10, 3 }
  0x11   : > { %p3184_p4 = por %p3765_p1, %p88_p0  ;;  %p3189_p6 = por %p248_p3, %p88_p0 }
  0x12   : > { %p3194_p8 = pnand %p1874_p5, %p255_p7  ;;  %s3086_s16 = smov [#allocation9]  }
  0x13   : > { %s3782_s13 = scalar_select %p3184_p4, 1, 0 }
  0x14   : > { %s3783_s14 = scalar_select %p3189_p6, 1, 0 }
  0x15   : > { %s3785_s15 = scalar_select %p3194_p8, 1, 0 }
  0x16   : > { %3784 = sst [smem:[#allocation20_spill]] %s3783_s14  ;;  %p2674_p10 = pneg %p3194_p8 }
  0x17   : > { %s283_s17 = sshll.u32 %s3086_s16, 4  ;;  %s3087_s19 = smov [#allocation10]   ;;  %s284_s17 = int_to_ptr.vmem [resolvable:$true] %s283_s17 }
  0x18   : > { %p3203_p11 = pnand %p2674_p10, %p3765_p1  ;;  %s299_s20 = sshll.u32 %s3087_s19, 4  ;;  %s3207_s20 = int_to_ptr.vmem [resolvable:$true] %s299_s20 }
  0x19   : > { %s3787_s2 = sld [smem:[#allocation22_spill]] }
  0x1a   : > { %p3217_p13 = pneg %p3203_p11 }
  0x1f   : > { %s2848_s23 = scalar_lea.hbm %s3787_s2, 2048 }
  0x20   : > { %p2849_p12 = scmp.ne.s32.totalorder %s3787_s2, %s2848_s23  ;;  %p2855_p5 = scmp.lt.u32.totalorder %s2848_s23, %s3787_s2 }
  0x22   : > { %p2851_p0 = pnand %p3217_p13, %p2849_p12 }
  0x24   : > { %p2852_p3 = pneg %p2851_p0 }
  0x26   : > { %p2857_p7 = pnand %p2855_p5, %p2852_p3 }
  0x28   : > { %2860 = shalt.err (!%p2857_p7)
}
  0x29   : > { %s2861_s19 = scalar_lea.vmem %s284_s17, 2048  ;;  %p2869_p2 = scmp.lt.s32.totalorder %s284_s17, %s284_s17 }
  0x2a   : > { %p2862_p10 = scmp.ne.s32.totalorder %s284_s17, %s2861_s19  ;;  %p2870_p6 = scmp.lt.s32.totalorder %s2861_s19, %s2861_s19 }
  0x2c   : > { %p2864_p9 = pnand %p2862_p10, %p3217_p13  ;;  %p2871_p4 = por %p2870_p6, %p2869_p2 }
  0x2e   : > { %p2865_p1 = pneg %p2864_p9 }
  0x30   : > { %p2872_p8 = pnand %p2871_p4, %p2865_p1 }
  0x32   : > { %2875 = shalt.err (!%p2872_p8)
}
  0x33   : > { %s3771_s21 = smov 128   ;;  %s3773_s22 = smov 8  }
  0x34   : > { %2680 = dma.hbm_to_vmem [thread:$0]  (!%p3203_p11), %s3787_s2, 2048, %s284_s17, [#allocation8], %s3771_s21, %s3771_s21, %s3773_s22  }
  0x35   : > { %s3789_s4 = sld [smem:[#allocation23_spill]] }
  0x3b   : > { %s2876_s16 = scalar_lea.hbm %s3789_s4, 6144 }
  0x3c   : > { %p2877_p1 = scmp.ne.s32.totalorder %s3789_s4, %s2876_s16  ;;  %p2883_p6 = scmp.lt.u32.totalorder %s2876_s16, %s3789_s4 }
  0x3e   : > { %p2879_p2 = pnand %p2877_p1, %p3217_p13 }
  0x40   : > { %p2880_p4 = pneg %p2879_p2 }
  0x42   : > { %p2885_p8 = pnand %p2883_p6, %p2880_p4 }
  0x44   : > { %2888 = shalt.err (!%p2885_p8)
}
  0x45   : > { %s2889_s17 = scalar_lea.vmem %s3207_s20, 6144  ;;  %p2897_p3 = scmp.lt.s32.totalorder %s3207_s20, %s3207_s20 }
  0x46   : > { %p2890_p9 = scmp.ne.s32.totalorder %s3207_s20, %s2889_s17  ;;  %p2898_p5 = scmp.lt.s32.totalorder %s2889_s17, %s2889_s17 }
  0x48   : > { %p2892_p12 = pnand %p2890_p9, %p3217_p13  ;;  %p2899_p7 = por %p2898_p5, %p2897_p3 }
  0x4a   : > { %p2893_p0 = pneg %p2892_p12 }
  0x4c   : > { %p2900_p10 = pnand %p2899_p7, %p2893_p0 }
  0x4e   : > { %2903 = shalt.err (!%p2900_p10)
}
  0x4f   : > { %s3775_s14 = smov 384   ;;  %s3776_s8 = smov 24  }
  0x50   : > { %2683 = dma.hbm_to_vmem [thread:$0]  (!%p3203_p11), %s3789_s4, 6144, %s3207_s20, [#allocation11], %s3775_s14, %s3775_s14, %s3776_s8  }
  0x51   : > { %s3092_s24 = smov [#allocation4]   ;;  %s3790_s0 = sld [smem:[#allocation21_spill]] }
  0x52   : > { %s270_s25 = sshll.u32 %s3092_s24, 4  ;;  %s271_s25 = int_to_ptr.vmem [resolvable:$true] %s270_s25 }
  0x57   : > { %s2904_s19 = scalar_lea.hbm %s3790_s0, 256 }
  0x58   : > { %p2905_p1 = scmp.ne.s32.totalorder %s3790_s0, %s2904_s19  ;;  %p2911_p6 = scmp.lt.u32.totalorder %s2904_s19, %s3790_s0 }
  0x5a   : > { %p2907_p2 = pnand %p2905_p1, %p3217_p13 }
  0x5c   : > { %p2908_p4 = pneg %p2907_p2 }
  0x5e   : > { %p2913_p8 = pnand %p2911_p6, %p2908_p4 }
  0x60   : > { %2916 = shalt.err (!%p2913_p8)
}
  0x61   : > { %s2917_s20 = scalar_lea.vmem %s271_s25, 256  ;;  %p2925_p3 = scmp.lt.s32.totalorder %s271_s25, %s271_s25 }
  0x62   : > { %p2918_p9 = scmp.ne.s32.totalorder %s271_s25, %s2917_s20  ;;  %p2926_p5 = scmp.lt.s32.totalorder %s2917_s20, %s2917_s20 }
  0x64   : > { %p2920_p12 = pnand %p2918_p9, %p3217_p13  ;;  %p2927_p7 = por %p2926_p5, %p2925_p3 }
  0x66   : > { %p2921_p0 = pneg %p2920_p12 }
  0x68   : > { %p2928_p10 = pnand %p2927_p7, %p2921_p0 }
  0x6a   : > { %2931 = shalt.err (!%p2928_p10)
}
  0x6b   : > { %s3791_s21 = smov 8   ;;  %s3792_s27 = smov 128  }
  0x6c   : > { %2677 = dma.hbm_to_vmem [thread:$0]  (!%p3203_p11), %s3790_s0, 256, %s271_s25, [#allocation5], %s3792_s27, %s3792_s27, %s3791_s21  }
  0x6d   : > { %s3093_s23 = smov [#allocation12]   ;;  %s2932_s19 = scalar_lea.hbm %s3761_s5, 6144 }
  0x6e   : > { %s312_s24 = sshll.u32 %s3093_s23, 4  ;;  %p2933_p1 = scmp.ne.s32.totalorder %s3761_s5, %s2932_s19  ;;  %s313_s24 = int_to_ptr.vmem [resolvable:$true] %s312_s24 }
  0x6f   : > { %p2939_p6 = scmp.lt.u32.totalorder %s2932_s19, %s3761_s5 }
  0x70   : > { %p2935_p2 = pnand %p2933_p1, %p3217_p13 }
  0x72   : > { %p2936_p4 = pneg %p2935_p2 }
  0x74   : > { %p2941_p8 = pnand %p2939_p6, %p2936_p4 }
  0x76   : > { %2944 = shalt.err (!%p2941_p8)
}
  0x77   : > { %s2945_s25 = scalar_lea.vmem %s313_s24, 6144  ;;  %p2953_p3 = scmp.lt.s32.totalorder %s313_s24, %s313_s24 }
  0x78   : > { %p2946_p9 = scmp.ne.s32.totalorder %s313_s24, %s2945_s25  ;;  %p2954_p5 = scmp.lt.s32.totalorder %s2945_s25, %s2945_s25 }
  0x7a   : > { %p2948_p12 = pnand %p2946_p9, %p3217_p13  ;;  %p2955_p7 = por %p2954_p5, %p2953_p3 }
  0x7c   : > { %p2949_p0 = pneg %p2948_p12 }
  0x7e   : > { %p2956_p10 = pnand %p2955_p7, %p2949_p0 }
  0x80   : > { %2959 = shalt.err (!%p2956_p10)
}
  0x81   : > { %s3793_s2 = smov 24   ;;  %s3794_s22 = smov 384  }
  0x82   : > { %2686 = dma.hbm_to_vmem [thread:$0]  (!%p3203_p11), %s3761_s5, 6144, %s313_s24, [#allocation11], %s3794_s22, %s3794_s22, %s3793_s2  }
  0x83   : > { %s35_s18 = sadd.s32 1, %s3080_s9  ;;  %s75_s26 = sadd.s32 1, %s3072_s29 }
  0x84   : > { %p36_p13 = scmp.ge.s32.totalorder %s35_s18, 2  ;;  %p82_p1 = scmp.ne.s32.totalorder %s3072_s29, %s3068_s28 }
  0x85   : > { %p83_p2 = scmp.eq.s32.totalorder %s3084_s10, 0  ;;  %p2699_p4 = scmp.lt.s32.totalorder %s3084_s10, 2 }
  0x86   : > { %s3817_s18 = smov (%p36_p13, %s35_s18), 0  ;;  %p3795_p8 = scmp.eq.s32.totalorder %s3175_s11, 1 }
  0x87   : > { %p84_p6 = por %p83_p2, %p82_p1  ;;  %s72_s12 = ssub.s32 %s3080_s9, %s3817_s18 }
  0x88   : > { %p3314_p9 = por %p3795_p8, %p82_p1  ;;  %s332_s16 = sand.u32 1, %s3084_s10  }
  0x89   : > { %p73_p12 = scmp.eq.s32.totalorder %s72_s12, 0  ;;  %s334_s19 = sand.u32 1, %s3072_s29  }
  0x8a   : > { %s1919_s24 = sshll.u32 %s3080_s9, 10  ;;  %s1880_s20 = sshll.u32 %s334_s19, 6 }
  0x8b   : > { %s3324_s17 = scalar_select %p73_p12, %s3072_s29, %s75_s26  }
  0x8c   : > { %s3329_s22 = scalar_lea.hbm %s3757_s1, %s1919_s24  ;;  %p3331_p11 = pnand %p2699_p4, %p84_p6 }
  0x8d   : > { %s336_s8 = scalar_lea.vmem [#allocation7], %s1880_s20  ;;  %s3337_s26 = scalar_lea.sflag [#allocation8], %s332_s16 }
  0x8e   : > { %s345_s12 = sshll.u32 %s336_s8, 4  ;;  %s2960_s19 = scalar_lea.hbm %s3329_s22, 1024  ;;  %s3335_s12 = int_to_ptr.vmem [resolvable:$true] %s345_s12 }
  0x8f   : > { %p2961_p0 = scmp.ne.s32.totalorder %s3329_s22, %s2960_s19  ;;  %p2962_p3 = pneg %p3331_p11 }
  0x90   : > { %s2965_s2 = scalar_lea.hbm %s3757_s1, 2048  ;;  %p2966_p10 = scmp.lt.u32.totalorder %s3329_s22, %s3757_s1 }
  0x91   : > { %p2963_p5 = pnand %p2962_p3, %p2961_p0  ;;  %p2967_p13 = scmp.lt.u32.totalorder %s2965_s2, %s2960_s19 }
  0x92   : > { %p2969_p2 = scmp.lt.u32.totalorder %s2960_s19, %s3329_s22 }
  0x93   : > { %p2964_p7 = pneg %p2963_p5  ;;  %p2968_p1 = por %p2967_p13, %p2966_p10 }
  0x95   : > { %p2970_p4 = por %p2969_p2, %p2968_p1 }
  0x97   : > { %p2971_p6 = pnand %p2970_p4, %p2964_p7 }
  0x99   : > { %2974 = shalt.err (!%p2971_p6)
}
  0x9a   : > { %s2975_s16 = scalar_lea.vmem %s3335_s12, 1024  ;;  %s3094_s20 = smov [#allocation7]  }
  0x9b   : > { %p2976_p8 = scmp.ne.s32.totalorder %s3335_s12, %s2975_s16  ;;  %s2980_s8 = sshll.u32 %s3094_s20, 4  ;;  %s2981_s8 = int_to_ptr.vmem [resolvable:$false] %s2980_s8 }
  0x9c   : > { %s2982_s0 = scalar_lea.vmem %s2981_s8, 2048  ;;  %p2983_p5 = scmp.lt.s32.totalorder %s3335_s12, %s2981_s8 }
  0x9d   : > { %p2978_p12 = pnand %p2976_p8, %p2962_p3  ;;  %p2984_p10 = scmp.lt.s32.totalorder %s2982_s0, %s2975_s16 }
  0x9f   : > { %p2979_p0 = pneg %p2978_p12  ;;  %p2985_p13 = por %p2984_p10, %p2983_p5 }
  0xa1   : > { %p2986_p1 = pnand %p2985_p13, %p2979_p0 }
  0xa3   : > { %2989 = shalt.err (!%p2986_p1)
}
  0xa4   : > { %2690 = dma.hbm_to_vmem [thread:$0]  (!%p3331_p11), %s3329_s22, 1024, %s3335_s12, %s3337_s26, %s3792_s27, %s3792_s27, %s3791_s21  }
  0xa5   : > { %p3798_p3 = scmp.ne.s32.totalorder %s3785_s15, 0 }
  0xa6   : > { %p3799_p7 = scmp.eq.s32.totalorder (!%p3798_p3), %s3175_s11, 0 }
  0xa7   : > { %357 = sbr.rel (%p3798_p3) target bundleno = 1579 (0x62b), region = 52 }
  0xae   : > { %3043 = dma.done.wait (%p3799_p7), [#allocation5], 256   ;;  %p3800_p2 = pmov %p3799_p7 }
  0xaf   : > { %s363_s4 = sand.u32 1, %s3175_s11   ;;  %s365_s14 = sand.u32 1, %s3068_s28  }
  0xb0   : > { %3045 = vsyncadd (%p3800_p2), [#allocation5], 4294967040  ;;  %s1885_s19 = sshll.u32 %s365_s14, 6  ;;  %s364_s24 = scalar_lea.sflag [#allocation8], %s363_s4 }
  0xb1   : > { %s3378_s25 = scalar_lea.vmem [#allocation7], %s1885_s19  ;;  %p3801_p11 = scmp.ne.s32.totalorder %s3782_s13, 0 }
  0xb3   : > { %3047 = dma.done.wait (%p3801_p11), %s364_s24, 1024  }
  0xb4   : > { %3049 = vsyncadd (%p3801_p11), %s364_s24, 4294966272  ;;  %p3802_p4 = pmov %p3800_p2 }
  0xb5   : > { %p3803_p6 = pmov %p3800_p2 }
  0xb6   : > { %3051 = dma.done.wait (%p3802_p4), [#allocation8], 2048  }
  0xb7   : > { %3053 = vsyncadd (%p3803_p6), [#allocation8], 4294965248  ;;  %p3804_p8 = pmov %p3800_p2 }
  0xb8   : > { %p3805_p12 = pmov %p3800_p2 }
  0xb9   : > { %3055 = dma.done.wait (%p3804_p8), [#allocation11], 12288  }
  0xba   : > { %3057 = vsyncadd (%p3805_p12), [#allocation11], 4294955008  ;;  %s3392_s15 = scalar_lea.vmem [#allocation13], %s1885_s19  ;;  %p1890_p0 = scmp.ne.s32.totalorder %s3076_s30, 0 }
  0xbb   : > { %v425_v0 = vld [vmem:[#allocation9] sm:$0xff] (!%p1890_p0)  ;;  %v426_v1 = vld [vmem:[#allocation9 + $0x8] sm:$0xff] (!%p1890_p0)  ;;  %v427_v2 = vld [vmem:[#allocation9 + $0x10] sm:$0xff] (!%p1890_p0) }
  0xbc   : > { %422 = sbr.rel (%p1890_p0) target bundleno = 449 (0x1c1), region = 76  ;;  %v2254_v3 = vpack.c.bf16 (!%p1890_p0), %v426_v1, %v425_v0  ;;  %v428_v4 = vld [vmem:[#allocation9 + $0x18] sm:$0xff] (!%p1890_p0)  ;;  %v429_v6 = vld [vmem:[#allocation9 + $0x20] sm:$0xff] (!%p1890_p0)  ;;  %v430_v7 = vld [vmem:[#allocation9 + $0x28] sm:$0xff] (!%p1890_p0) }
  0xbd   : > { %v2258_v5 = vpack.c.bf16 (!%p1890_p0), %v428_v4, %v427_v2  ;;  %v2262_v8 = vpack.c.bf16 (!%p1890_p0), %v430_v7, %v429_v6  ;;  %v423_v9 = vld [vmem:[#allocation4] sm:$0xff] (!%p1890_p0)  ;;  %v432_v11 = vld [vmem:[#allocation9 + $0x38] sm:$0xff] (!%p1890_p0)  ;;  %v433_v13 = vld [vmem:[#allocation9 + $0x40] sm:$0xff] (!%p1890_p0) }
  0xbe   : > { %2255 = vmatprep.subr.bf16.mxu0 (!%p1890_p0), %v2254_v3  ;;  %v431_v10 = vld [vmem:[#allocation9 + $0x30] sm:$0xff] (!%p1890_p0)  ;;  %2067 = vmatprep.mubr.f32.mxu0 (!%p1890_p0), %v423_v9  ;;  %v434_v14 = vld [vmem:[#allocation9 + $0x48] sm:$0xff] (!%p1890_p0)  ;;  %v436_v17 = vld [vmem:[#allocation9 + $0x58] sm:$0xff] (!%p1890_p0) }
  0xbf   : > { %2257 = vmatpush3.bf16.msra.mxu0 (!%p1890_p0), %v2254_v3  ;;  %v2266_v12 = vpack.c.bf16 (!%p1890_p0), %v432_v11, %v431_v10  ;;  %v2270_v15 = vpack.c.bf16 (!%p1890_p0), %v434_v14, %v433_v13  ;;  %v435_v16 = vld [vmem:[#allocation9 + $0x50] sm:$0xff] (!%p1890_p0)  ;;  %v437_v19 = vld [vmem:[#allocation9 + $0x60] sm:$0xff] (!%p1890_p0)  ;;  %v438_v20 = vld [vmem:[#allocation9 + $0x68] sm:$0xff] (!%p1890_p0) }
  0xc0   : > { %2259 = vmatprep.subr.bf16.mxu0 (!%p1890_p0), %v2258_v5  ;;  %v2274_v18 = vpack.c.bf16 (!%p1890_p0), %v436_v17, %v435_v16  ;;  %v2278_v21 = vpack.c.bf16 (!%p1890_p0), %v438_v20, %v437_v19  ;;  %v439_v22 = vld [vmem:[#allocation9 + $0x70] sm:$0xff] (!%p1890_p0)  ;;  %v440_v23 = vld [vmem:[#allocation9 + $0x78] sm:$0xff] (!%p1890_p0)  ;;  %v1891_v26 = vld [vmem:[%s3759_s3] ss:$0 sm:$0xff] (!%p1890_p0) }
  0xc1   : > { %v2282_v24 = vpack.c.bf16 (!%p1890_p0), %v440_v23, %v439_v22  ;;  %v424_v25 = vld [vmem:[#allocation4 + $0x8] sm:$0xff] (!%p1890_p0) }
  0xc3   : > { %2261 = vmatpush3.bf16.msra.mxu0 %v2258_v5 }
  0xc4   : > { %2263 = vmatprep.subr.bf16.mxu0 %v2262_v8 }
  0xc7   : > { %2265 = vmatpush3.bf16.msra.mxu0 %v2262_v8 }
  0xc8   : > { %2267 = vmatprep.subr.bf16.mxu0 %v2266_v12 }
  0xcb   : > { %2269 = vmatpush3.bf16.msra.mxu0 %v2266_v12 }
  0xcc   : > { %2271 = vmatprep.subr.bf16.mxu0 %v2270_v15 }
  0xcf   : > { %2273 = vmatpush3.bf16.msra.mxu0 %v2270_v15 }
  0xd0   : > { %2275 = vmatprep.subr.bf16.mxu0 %v2274_v18 }
  0xd3   : > { %2277 = vmatpush3.bf16.msra.mxu0 %v2274_v18 }
  0xd4   : > { %2279 = vmatprep.subr.bf16.mxu0 %v2278_v21 }
  0xd7   : > { %2281 = vmatpush3.bf16.msra.mxu0 %v2278_v21 }
  0xd8   : > { %2283 = vmatprep.subr.bf16.mxu0 %v2282_v24 }
  0xdb   : > { %2285 = vmatpush3.bf16.msra.mxu0 %v2282_v24 }
  0xde   : > { %2068 = vmatmul.mubr.f32.vlgmr.msra.gmra.mrb[0].mxu0 %v424_v25 }
 0x1b1   : > { %v2069_v27 = vpop.f32.mrb[0].mxu0 }
 0x1b2   : > { %v520_v28 = vadd.f32 %v2069_v27, %v1891_v26  ;;  %v514_v29 = vpop.f32.mrb[1].mxu0 }
 0x1b3   : > { %v515_v30 = vadd.f32 %v1891_v26, %v514_v29 }
 0x1b4   : > { %2764 = vtanh.f32 %v520_v28 }
 0x1b5   : > { %2766 = vtanh.f32 %v515_v30 }
 0x1be   : > { %v2765_v31 = vpop.eup %2764 }
 0x1bf   : > { %v2767_v32 = vpop.eup %2766  ;;  %526 = vst [vmem:[#allocation2 + $0x8] sm:$0xff] %v2765_v31 }
 0x1c0   : > { %525 = vst [vmem:[#allocation2] sm:$0xff] %v2767_v32 }
 0x1c1 PF: > { %v536_v33 = vld [vmem:[#allocation10 + $0x8] sm:$0xff]  ;;  %v539_v34 = vld [vmem:[#allocation10 + $0x20] sm:$0xff]  ;;  %v538_v37 = vld [vmem:[#allocation10 + $0x18] sm:$0xff]  ;;  %v3095_v40 = vmov 0.0   ;;  %s1920_s26 = sshll.u32 %s3076_s30, 10  ;;  %s1742_s2 = sshll.u32 %s3392_s15, 4  ;;  %s3704_s2 = int_to_ptr.vmem [resolvable:$true] %s1742_s2 }
 0x1c2   : > { %v535_v35 = vld [vmem:[#allocation10] sm:$0xff]  ;;  %v2286_v36 = vpack.c.bf16 %v539_v34, %v536_v33  ;;  %v542_v38 = vld [vmem:[#allocation10 + $0x38] sm:$0xff]  ;;  %v545_v39 = vld [vmem:[#allocation10 + $0x50] sm:$0xff]  ;;  %664 = vmatprep.mubr.f32.mxu0 %v3095_v40  ;;  %s3806_s8 = sld [smem:[#allocation24_spill]]  ;;  %s3709_s30 = scalar_lea.sflag [#allocation6], %s365_s14 }
 0x1c3   : > { %v2288_v41 = vpack.c.bf16 %v538_v37, %v535_v35  ;;  %v2290_v42 = vpack.c.bf16 %v545_v39, %v542_v38  ;;  %v541_v43 = vld [vmem:[#allocation10 + $0x30] sm:$0xff]  ;;  %v544_v44 = vld [vmem:[#allocation10 + $0x48] sm:$0xff]  ;;  %v551_v46 = vld [vmem:[#allocation10 + $0x80] sm:$0xff]  ;;  %s2990_s4 = scalar_lea.vmem %s3704_s2, 1024  ;;  %s3096_s19 = smov [#allocation13]  }
 0x1c4   : > { %v548_v45 = vld [vmem:[#allocation10 + $0x68] sm:$0xff]  ;;  %2287 = vmatprep.subr.bf16.mxu0 %v2286_v36  ;;  %v2292_v47 = vpack.c.bf16 %v544_v44, %v541_v43  ;;  %v547_v49 = vld [vmem:[#allocation10 + $0x60] sm:$0xff]  ;;  %v550_v50 = vld [vmem:[#allocation10 + $0x78] sm:$0xff]  ;;  %p2991_p5 = scmp.ne.s32.totalorder %s3704_s2, %s2990_s4  ;;  %s2994_s24 = sshll.u32 %s3096_s19, 4  ;;  %s2995_s24 = int_to_ptr.vmem [resolvable:$false] %s2994_s24 }
 0x1c5   : > { %2289 = vmatpush1.bf16.msra.mxu0 %v2288_v41  ;;  %v2294_v48 = vpack.c.bf16 %v551_v46, %v548_v45  ;;  %v554_v51 = vld [vmem:[#allocation10 + $0x98] sm:$0xff]  ;;  %v557_v52 = vld [vmem:[#allocation10 + $0xb0] sm:$0xff]  ;;  %v2296_v53 = vpack.c.bf16 %v550_v50, %v547_v49  ;;  %v556_v56 = vld [vmem:[#allocation10 + $0xa8] sm:$0xff]  ;;  %p2997_p1 = scmp.lt.s32.totalorder %s3704_s2, %s2995_s24 }
 0x1c6   : > { %2291 = vmatprep.subr.bf16.mxu0 %v2290_v42  ;;  %v553_v54 = vld [vmem:[#allocation10 + $0x90] sm:$0xff]  ;;  %v2298_v55 = vpack.c.bf16 %v557_v52, %v554_v51  ;;  %v540_v58 = vld [vmem:[#allocation10 + $0x28] sm:$0xff]  ;;  %v563_v60 = vld [vmem:[#allocation10 + $0xe0] sm:$0xff]  ;;  %p2992_p10 = pnand %p2991_p5, %p3314_p9 }
 0x1c7   : > { %v537_v57 = vld [vmem:[#allocation10 + $0x10] sm:$0xff]  ;;  %v560_v59 = vld [vmem:[#allocation10 + $0xc8] sm:$0xff]  ;;  %v543_v62 = vld [vmem:[#allocation10 + $0x40] sm:$0xff]  ;;  %v2300_v0 = vpack.c.bf16 %v556_v56, %v553_v54 }
 0x1c8   : > { %v2318_v61 = vpack.c.bf16 %v540_v58, %v537_v57  ;;  %v546_v63 = vld [vmem:[#allocation10 + $0x58] sm:$0xff]  ;;  %v559_v1 = vld [vmem:[#allocation10 + $0xc0] sm:$0xff]  ;;  %v2302_v4 = vpack.c.bf16 %v563_v60, %v560_v59  ;;  %v549_v6 = vld [vmem:[#allocation10 + $0x70] sm:$0xff]  ;;  %s3702_s0 = scalar_lea.hbm %s3806_s8, %s1920_s26  ;;  %p2993_p13 = pneg %p2992_p10 }
 0x1c9   : > { %2293 = vmatpush1.bf16.msra.mxu0 %v2292_v47  ;;  %v562_v2 = vld [vmem:[#allocation10 + $0xd8] sm:$0xff]  ;;  %v2322_v3 = vpack.c.bf16 %v546_v63, %v543_v62  ;;  %v3400_v5 = vld [vmem:[%s3378_s25] sm:$0xff]  ;;  %v552_v7 = vld [vmem:[#allocation10 + $0x88] sm:$0xff] }
 0x1ca   : > { %2295 = vmatprep.subr.bf16.mxu0 %v2294_v48  ;;  %2319 = vmatprep.subr.bf16.mxu1 %v2318_v61  ;;  %v566_v8 = vld [vmem:[#allocation10 + $0xf8] sm:$0xff]  ;;  %v569_v9 = vld [vmem:[#allocation10 + $0x110] sm:$0xff]  ;;  %v2326_v10 = vpack.c.bf16 %v552_v7, %v549_v6  ;;  %v555_v11 = vld [vmem:[#allocation10 + $0xa0] sm:$0xff]  ;;  %v2304_v13 = vpack.c.bf16 %v562_v2, %v559_v1 }
 0x1cb   : > { %2321 = vmatpush3.bf16.msra.mxu1 %v2318_v61  ;;  %2102 = vmatprep.mubr.f32.mxu1 %v3400_v5  ;;  %v558_v12 = vld [vmem:[#allocation10 + $0xb8] sm:$0xff]  ;;  %v2306_v14 = vpack.c.bf16 %v569_v9, %v566_v8  ;;  %v565_v15 = vld [vmem:[#allocation10 + $0xf0] sm:$0xff]  ;;  %v568_v16 = vld [vmem:[#allocation10 + $0x108] sm:$0xff] }
 0x1cc   : > { %2323 = vmatprep.subr.bf16.mxu1 %v2322_v3  ;;  %v572_v17 = vld [vmem:[#allocation10 + $0x128] sm:$0xff]  ;;  %v575_v18 = vld [vmem:[#allocation10 + $0x140] sm:$0xff]  ;;  %v2330_v19 = vpack.c.bf16 %v558_v12, %v555_v11  ;;  %v561_v20 = vld [vmem:[#allocation10 + $0xd0] sm:$0xff]  ;;  %v2308_v22 = vpack.c.bf16 %v568_v16, %v565_v15 }
 0x1cd   : > { %2297 = vmatpush1.bf16.msra.mxu0 %v2296_v53  ;;  %v564_v21 = vld [vmem:[#allocation10 + $0xe8] sm:$0xff]  ;;  %v2310_v23 = vpack.c.bf16 %v575_v18, %v572_v17  ;;  %v571_v24 = vld [vmem:[#allocation10 + $0x120] sm:$0xff]  ;;  %v574_v25 = vld [vmem:[#allocation10 + $0x138] sm:$0xff] }
 0x1ce   : > { %2299 = vmatprep.subr.bf16.mxu0 %v2298_v55  ;;  %v578_v26 = vld [vmem:[#allocation10 + $0x158] sm:$0xff]  ;;  %v581_v27 = vld [vmem:[#allocation10 + $0x170] sm:$0xff]  ;;  %v2334_v28 = vpack.c.bf16 %v564_v21, %v561_v20  ;;  %v567_v29 = vld [vmem:[#allocation10 + $0x100] sm:$0xff]  ;;  %v2312_v31 = vpack.c.bf16 %v574_v25, %v571_v24 }
 0x1cf   : > { %2325 = vmatpush3.bf16.msra.mxu1 %v2322_v3  ;;  %v570_v30 = vld [vmem:[#allocation10 + $0x118] sm:$0xff]  ;;  %v2314_v32 = vpack.c.bf16 %v581_v27, %v578_v26  ;;  %v577_v33 = vld [vmem:[#allocation10 + $0x150] sm:$0xff]  ;;  %v580_v34 = vld [vmem:[#allocation10 + $0x168] sm:$0xff] }
 0x1d0   : > { %2327 = vmatprep.subr.bf16.mxu1 %v2326_v10  ;;  %v843_v35 = vld [vmem:[#allocation12 + $0x8] sm:$0xff]  ;;  %v846_v36 = vld [vmem:[#allocation12 + $0x20] sm:$0xff]  ;;  %v2338_v37 = vpack.c.bf16 %v570_v30, %v567_v29  ;;  %v573_v38 = vld [vmem:[#allocation10 + $0x130] sm:$0xff]  ;;  %v2316_v41 = vpack.c.bf16 %v580_v34, %v577_v33 }
 0x1d1   : > { %2301 = vmatpush1.bf16.msra.mxu0 %v2300_v0  ;;  %v576_v39 = vld [vmem:[#allocation10 + $0x148] sm:$0xff]  ;;  %v3403_v42 = vpack.c.bf16 %v846_v36, %v843_v35  ;;  %v842_v43 = vld [vmem:[#allocation12] sm:$0xff]  ;;  %v845_v44 = vld [vmem:[#allocation12 + $0x18] sm:$0xff] }
 0x1d2   : > { %2303 = vmatprep.subr.bf16.mxu0 %v2302_v4  ;;  %v849_v45 = vld [vmem:[#allocation12 + $0x38] sm:$0xff]  ;;  %v852_v46 = vld [vmem:[#allocation12 + $0x50] sm:$0xff]  ;;  %v2342_v47 = vpack.c.bf16 %v576_v39, %v573_v38  ;;  %v579_v48 = vld [vmem:[#allocation10 + $0x160] sm:$0xff]  ;;  %v3405_v50 = vpack.c.bf16 %v845_v44, %v842_v43 }
 0x1d3   : > { %2329 = vmatpush3.bf16.msra.mxu1 %v2326_v10  ;;  %v582_v49 = vld [vmem:[#allocation10 + $0x178] sm:$0xff]  ;;  %v3408_v51 = vpack.c.bf16 %v852_v46, %v849_v45  ;;  %v848_v52 = vld [vmem:[#allocation12 + $0x30] sm:$0xff]  ;;  %v851_v53 = vld [vmem:[#allocation12 + $0x48] sm:$0xff] }
 0x1d4   : > { %2331 = vmatprep.subr.bf16.mxu1 %v2330_v19  ;;  %v855_v54 = vld [vmem:[#allocation12 + $0x68] sm:$0xff]  ;;  %v858_v55 = vld [vmem:[#allocation12 + $0x80] sm:$0xff]  ;;  %v2346_v56 = vpack.c.bf16 %v582_v49, %v579_v48  ;;  %v844_v57 = vld [vmem:[#allocation12 + $0x10] sm:$0xff]  ;;  %v3414_v60 = vpack.c.bf16 %v851_v53, %v848_v52 }
 0x1d5   : > { %2305 = vmatpush1.bf16.msra.mxu0 %v2304_v13  ;;  %v847_v58 = vld [vmem:[#allocation12 + $0x28] sm:$0xff]  ;;  %v3417_v61 = vpack.c.bf16 %v858_v55, %v855_v54  ;;  %v854_v62 = vld [vmem:[#allocation12 + $0x60] sm:$0xff]  ;;  %v857_v63 = vld [vmem:[#allocation12 + $0x78] sm:$0xff] }
 0x1d6   : > { %2307 = vmatprep.subr.bf16.mxu0 %v2306_v14  ;;  %v528_v59 = vld [vmem:[%s3378_s25 + $0x8] sm:$0xff]  ;;  %v861_v0 = vld [vmem:[#allocation12 + $0x98] sm:$0xff]  ;;  %v864_v1 = vld [vmem:[#allocation12 + $0xb0] sm:$0xff]  ;;  %v3419_v2 = vpack.c.bf16 %v847_v58, %v844_v57  ;;  %v3424_v4 = vpack.c.bf16 %v857_v63, %v854_v62 }
 0x1d7   : > { %2333 = vmatpush3.bf16.msra.mxu1 %v2330_v19  ;;  %v529_v3 = vld [vmem:[%s3378_s25 + $0x10] sm:$0xff]  ;;  %v853_v6 = vld [vmem:[#allocation12 + $0x58] sm:$0xff]  ;;  %v3427_v7 = vpack.c.bf16 %v864_v1, %v861_v0  ;;  %v863_v9 = vld [vmem:[#allocation12 + $0xa8] sm:$0xff] }
 0x1d8   : > { %2335 = vmatprep.subr.bf16.mxu1 %v2334_v28  ;;  %v860_v8 = vld [vmem:[#allocation12 + $0x90] sm:$0xff]  ;;  %v867_v10 = vld [vmem:[#allocation12 + $0xc8] sm:$0xff]  ;;  %v870_v11 = vld [vmem:[#allocation12 + $0xe0] sm:$0xff] }
 0x1d9   : > { %2309 = vmatpush1.bf16.msra.mxu0 %v2308_v22  ;;  %v530_v13 = vld [vmem:[%s3378_s25 + $0x18] sm:$0xff]  ;;  %v3435_v14 = vpack.c.bf16 %v863_v9, %v860_v8  ;;  %v856_v15 = vld [vmem:[#allocation12 + $0x70] sm:$0xff]  ;;  %v859_v16 = vld [vmem:[#allocation12 + $0x88] sm:$0xff]  ;;  %v3438_v17 = vpack.c.bf16 %v870_v11, %v867_v10 }
 0x1da   : > { %2311 = vmatprep.subr.bf16.mxu0 %v2310_v23  ;;  %v866_v18 = vld [vmem:[#allocation12 + $0xc0] sm:$0xff]  ;;  %v869_v19 = vld [vmem:[#allocation12 + $0xd8] sm:$0xff]  ;;  %v876_v21 = vld [vmem:[#allocation12 + $0x110] sm:$0xff]  ;;  %v3442_v22 = vpack.c.bf16 %v859_v16, %v856_v15 }
 0x1db   : > { %2337 = vmatpush3.bf16.msra.mxu1 %v2334_v28  ;;  %v873_v20 = vld [vmem:[#allocation12 + $0xf8] sm:$0xff]  ;;  %v531_v23 = vld [vmem:[%s3378_s25 + $0x20] sm:$0xff]  ;;  %v3447_v24 = vpack.c.bf16 %v869_v19, %v866_v18  ;;  %v872_v28 = vld [vmem:[#allocation12 + $0xf0] sm:$0xff] }
 0x1dc   : > { %2339 = vmatprep.subr.bf16.mxu1 %v2338_v37  ;;  %v862_v25 = vld [vmem:[#allocation12 + $0xa0] sm:$0xff]  ;;  %v865_v26 = vld [vmem:[#allocation12 + $0xb8] sm:$0xff]  ;;  %v3450_v27 = vpack.c.bf16 %v876_v21, %v873_v20  ;;  %v875_v29 = vld [vmem:[#allocation12 + $0x108] sm:$0xff] }
 0x1dd   : > { %2313 = vmatpush1.bf16.msra.mxu0 %v2312_v31  ;;  %v879_v30 = vld [vmem:[#allocation12 + $0x128] sm:$0xff]  ;;  %v882_v31 = vld [vmem:[#allocation12 + $0x140] sm:$0xff]  ;;  %v3459_v34 = vpack.c.bf16 %v875_v29, %v872_v28  ;;  %v868_v35 = vld [vmem:[#allocation12 + $0xd0] sm:$0xff] }
 0x1de   : > { %2315 = vmatprep.subr.bf16.mxu0 %v2314_v32  ;;  %v3454_v32 = vpack.c.bf16 %v865_v26, %v862_v25  ;;  %v532_v33 = vld [vmem:[%s3378_s25 + $0x28] sm:$0xff]  ;;  %v3463_v38 = vpack.c.bf16 %v882_v31, %v879_v30  ;;  %v878_v39 = vld [vmem:[#allocation12 + $0x120] sm:$0xff]  ;;  %v885_v43 = vld [vmem:[#allocation12 + $0x158] sm:$0xff] }
 0x1df   : > { %2341 = vmatpush3.bf16.msra.mxu1 %v2338_v37  ;;  %v871_v36 = vld [vmem:[#allocation12 + $0xe8] sm:$0xff]  ;;  %v533_v37 = vld [vmem:[%s3378_s25 + $0x30] sm:$0xff]  ;;  %v874_v48 = vld [vmem:[#allocation12 + $0x100] sm:$0xff] }
 0x1e0   : > { %2343 = vmatprep.subr.bf16.mxu1 %v2342_v47  ;;  %v888_v44 = vld [vmem:[#allocation12 + $0x170] sm:$0xff]  ;;  %v3467_v45 = vpack.c.bf16 %v871_v36, %v868_v35  ;;  %v877_v49 = vld [vmem:[#allocation12 + $0x118] sm:$0xff]  ;;  %v887_v54 = vld [vmem:[#allocation12 + $0x168] sm:$0xff] }
 0x1e1   : > { %2317 = vmatpush1.bf16.msra.mxu0 %v2316_v41  ;;  %v881_v41 = vld [vmem:[#allocation12 + $0x138] sm:$0xff]  ;;  %v3475_v52 = vpack.c.bf16 %v888_v44, %v885_v43  ;;  %v884_v53 = vld [vmem:[#allocation12 + $0x150] sm:$0xff]  ;;  %v3477_v55 = vld [vmem:[#allocation2] sm:$0xff] }
 0x1e2   : > { %2351 = vmatprep.subr.bf16.mxu0 %v3403_v42  ;;  %v3471_v46 = vpack.c.bf16 %v881_v41, %v878_v39  ;;  %v3486_v57 = vpack.c.bf16 %v887_v54, %v884_v53  ;;  %v880_v58 = vld [vmem:[#allocation12 + $0x130] sm:$0xff]  ;;  %v886_v63 = vld [vmem:[#allocation12 + $0x160] sm:$0xff]  ;;  %v889_v0 = vld [vmem:[#allocation12 + $0x178] sm:$0xff] }
 0x1e3   : > { %2345 = vmatpush3.bf16.msra.mxu1 %v2342_v47  ;;  %v534_v47 = vld [vmem:[%s3378_s25 + $0x38] sm:$0xff]  ;;  %v3499_v1 = vpack.c.bf16 %v889_v0, %v886_v63  ;;  %v583_v9 = vld [vmem:[%s3762_s6] sm:$0x7]  ;;  %s2996_s25 = scalar_lea.vmem %s2995_s24, 2048 }
 0x1e4   : > { %665 = vmatmul.mubr.f32.vlgmr.msra.gmra.mrb[0].mxu0 %v3400_v5  ;;  %2347 = vmatprep.subr.bf16.mxu1 %v2346_v56  ;;  %v850_v5 = vld [vmem:[#allocation12 + $0x40] sm:$0xff]  ;;  %p2998_p3 = scmp.lt.s32.totalorder %s2996_s25, %s2990_s4 }
 0x1e5   : > { %2353 = vmatpush1.bf16.msra.mxu0 %v3405_v50  ;;  %670 = vmatprep.mubr.f32.mxu0 %v3095_v40  ;;  %v3430_v12 = vpack.c.bf16 %v853_v6, %v850_v5  ;;  %v585_v5 = vlaneseq  ;;  %v890_v28 = vld [vmem:[%s3763_s7] sm:$0x7] }
 0x1e6   : > { %2355 = vmatprep.subr.bf16.mxu0 %v3408_v51  ;;  %p2999_p7 = por %p2998_p3, %p2997_p1 }
 0x1e7   : > { %2349 = vmatpush3.bf16.msra.mxu1 %v2346_v56  ;;  %v3482_v56 = vpack.c.bf16 %v877_v49, %v874_v48  ;;  %v586_v6 = vshrl.u32 %v585_v5, 7 }
 0x1e8   : > { %671 = vmatmul.mubr.f32.gmra.mrb[2].mxu0 %v528_v59  ;;  %2383 = vmatprep.subr.bf16.mxu1 %v3419_v2  ;;  %p3000_p2 = pnand %p2999_p7, %p2993_p13 }
 0x1e9   : > { %2357 = vmatpush1.bf16.msra.mxu0 %v3414_v60  ;;  %676 = vmatprep.mubr.f32.mxu0 %v3095_v40  ;;  %v595_v8 = vsub.s32 2, %v586_v6  ;;  %v587_v26 = vsub.s32 0, %v586_v6  ;;  %v591_v39 = vsub.s32 1, %v586_v6 }
 0x1ea   : > { %2359 = vmatprep.subr.bf16.mxu0 %v3417_v61  ;;  %2103 = vmatmul.mubr.f32.vlgmr.msra.gmra.mrb[0].mxu1 %v528_v59  ;;  %v883_v59 = vld [vmem:[#allocation12 + $0x148] sm:$0xff] }
 0x1eb   : > { %2385 = vmatpush3.bf16.msra.mxu1 %v3419_v2  ;;  %2105 = vmatprep.mubr.f32.mxu1 %v529_v3  ;;  %v3491_v62 = vpack.c.bf16 %v883_v59, %v880_v58  ;;  %v588_v35 = vrot.slane %v583_v9, %v587_v26  ;;  %v906_v36 = vrot.slane %v890_v28, %v587_v26 }
 0x1ec   : > { %677 = vmatmul.mubr.f32.gmra.mrb[4].mxu0 %v529_v3  ;;  %2387 = vmatprep.subr.bf16.mxu1 %v3430_v12  ;;  %v3502_v3 = vld [vmem:[#allocation2 + $0x8] sm:$0xff]  ;;  %v592_v44 = vrot.slane %v583_v9, %v591_v39 }
 0x1ed   : > { %2361 = vmatpush1.bf16.msra.mxu0 %v3424_v4  ;;  %682 = vmatprep.mubr.f32.mxu0 %v3095_v40 }
 0x1ee   : > { %2363 = vmatprep.subr.bf16.mxu0 %v3427_v7  ;;  %2106 = vmatmul.mubr.f32.gmra.mrb[2].mxu1 %v530_v13 }
 0x1ef   : > { %2389 = vmatpush3.bf16.msra.mxu1 %v3430_v12  ;;  %2108 = vmatprep.mubr.f32.mxu1 %v531_v23 }
 0x1f0   : > { %683 = vmatmul.mubr.f32.gmra.mrb[6].mxu0 %v530_v13  ;;  %2391 = vmatprep.subr.bf16.mxu1 %v3442_v22  ;;  %v596_v13 = vrot.slane %v583_v9, %v595_v8 }
 0x1f1   : > { %2365 = vmatpush1.bf16.msra.mxu0 %v3435_v14  ;;  %688 = vmatprep.mubr.f32.mxu0 %v3095_v40 }
 0x1f2   : > { %2367 = vmatprep.subr.bf16.mxu0 %v3438_v17  ;;  %2109 = vmatmul.mubr.f32.gmra.mrb[4].mxu1 %v532_v33 }
 0x1f3   : > { %2393 = vmatpush3.bf16.msra.mxu1 %v3442_v22  ;;  %2111 = vmatprep.mubr.f32.mxu1 %v533_v37 }
 0x1f4   : > { %689 = vmatmul.mubr.f32.gmra.mrb[8].mxu0 %v531_v23  ;;  %2395 = vmatprep.subr.bf16.mxu1 %v3454_v32 }
 0x1f5   : > { %2369 = vmatpush1.bf16.msra.mxu0 %v3447_v24  ;;  %694 = vmatprep.mubr.f32.mxu0 %v3095_v40 }
 0x1f6   : > { %2371 = vmatprep.subr.bf16.mxu0 %v3450_v27  ;;  %2112 = vmatmul.mubr.f32.gmra.mrb[6].mxu1 %v534_v47 }
 0x1f7   : > { %2397 = vmatpush3.bf16.msra.mxu1 %v3454_v32  ;;  %2146 = vmatprep.mubr.f32.mxu1 %v3477_v55 }
 0x1f8   : > { %695 = vmatmul.mubr.f32.gmra.mrb[10].mxu0 %v532_v33  ;;  %2399 = vmatprep.subr.bf16.mxu1 %v3467_v45 }
 0x1f9   : > { %2373 = vmatpush1.bf16.msra.mxu0 %v3459_v34  ;;  %700 = vmatprep.mubr.f32.mxu0 %v3095_v40 }
 0x1fa   : > { %2375 = vmatprep.subr.bf16.mxu0 %v3463_v38 }
 0x1fb   : > { %2401 = vmatpush3.bf16.msra.mxu1 %v3467_v45 }
 0x1fc   : > { %701 = vmatmul.mubr.f32.gmra.mrb[12].mxu0 %v533_v37  ;;  %2403 = vmatprep.subr.bf16.mxu1 %v3482_v56  ;;  %v3561_v37 = vadd.f32 %v906_v36, %v588_v35 }
 0x1fd   : > { %2377 = vmatpush1.bf16.msra.mxu0 %v3471_v46  ;;  %706 = vmatprep.mubr.f32.mxu0 %v3095_v40 }
 0x1fe   : > { %2379 = vmatprep.subr.bf16.mxu0 %v3475_v52 }
 0x1ff   : > { %2405 = vmatpush3.bf16.msra.mxu1 %v3482_v56 }
 0x200   : > { %707 = vmatmul.mubr.f32.gmra.mrb[14].mxu0 %v534_v47  ;;  %2407 = vmatprep.subr.bf16.mxu1 %v3491_v62  ;;  %v910_v47 = vrot.slane %v890_v28, %v591_v39 }
 0x201   : > { %2381 = vmatpush1.bf16.msra.mxu0 %v3486_v57  ;;  %982 = vmatprep.mubr.f32.mxu0 %v3095_v40 }
 0x202   : > { %2415 = vmatprep.subr.bf16.mxu0 %v3403_v42  ;;  %v3564_v54 = vadd.f32 %v910_v47, %v592_v44 }
 0x203   : > { %2409 = vmatpush3.bf16.msra.mxu1 %v3491_v62 }
 0x204   : > { %983 = vmatmul.mubr.f32.vlgmr.msra.gmra.mrb[0].mxu0 %v3477_v55  ;;  %2411 = vmatprep.subr.bf16.mxu1 %v3499_v1 }
 0x205   : > { %988 = vmatprep.mubr.f32.mxu0 %v3095_v40  ;;  %2417 = vmatpush1.bf16.msra.mxu0 %v3405_v50 }
 0x206   : > { %2419 = vmatprep.subr.bf16.mxu0 %v3408_v51 }
 0x207   : > { %2413 = vmatpush3.bf16.msra.mxu1 %v3499_v1 }
 0x208   : > { %989 = vmatmul.mubr.f32.gmra.mrb[2].mxu0 %v3502_v3  ;;  %2447 = vmatprep.subr.bf16.mxu1 %v3419_v2 }
 0x209   : > { %2421 = vmatpush1.bf16.msra.mxu0 %v3414_v60  ;;  %1185 = vmatprep.mubr.f32.mxu0 %v3095_v40 }
 0x20a   : > { %2423 = vmatprep.subr.bf16.mxu0 %v3417_v61  ;;  %2147 = vmatmul.mubr.f32.vlgmr.msra.gmra.mrb[8].mxu1 %v3502_v3 }
 0x20b   : > { %2449 = vmatpush3.bf16.msra.mxu1 %v3419_v2 }
 0x20c   : > { %2451 = vmatprep.subr.bf16.mxu1 %v3430_v12 }
 0x20d   : > { %2425 = vmatpush1.bf16.msra.mxu0 %v3424_v4 }
 0x20e   : > { %2427 = vmatprep.subr.bf16.mxu0 %v3427_v7 }
 0x20f   : > { %2453 = vmatpush3.bf16.msra.mxu1 %v3430_v12 }
 0x210   : > { %2455 = vmatprep.subr.bf16.mxu1 %v3442_v22 }
 0x211   : > { %2429 = vmatpush1.bf16.msra.mxu0 %v3435_v14 }
 0x212   : > { %2431 = vmatprep.subr.bf16.mxu0 %v3438_v17 }
 0x213   : > { %2457 = vmatpush3.bf16.msra.mxu1 %v3442_v22 }
 0x214   : > { %2459 = vmatprep.subr.bf16.mxu1 %v3454_v32 }
 0x215   : > { %2433 = vmatpush1.bf16.msra.mxu0 %v3447_v24 }
 0x216   : > { %2435 = vmatprep.subr.bf16.mxu0 %v3450_v27 }
 0x217   : > { %2461 = vmatpush3.bf16.msra.mxu1 %v3454_v32 }
 0x218   : > { %2463 = vmatprep.subr.bf16.mxu1 %v3467_v45 }
 0x219   : > { %2437 = vmatpush1.bf16.msra.mxu0 %v3459_v34 }
 0x21a   : > { %2439 = vmatprep.subr.bf16.mxu0 %v3463_v38 }
 0x21b   : > { %2465 = vmatpush3.bf16.msra.mxu1 %v3467_v45 }
 0x21c   : > { %2467 = vmatprep.subr.bf16.mxu1 %v3482_v56 }
 0x21d   : > { %2441 = vmatpush1.bf16.msra.mxu0 %v3471_v46 }
 0x21e   : > { %2443 = vmatprep.subr.bf16.mxu0 %v3475_v52 }
 0x21f   : > { %2469 = vmatpush3.bf16.msra.mxu1 %v3482_v56 }
 0x220   : > { %2471 = vmatprep.subr.bf16.mxu1 %v3491_v62 }
 0x221   : > { %2445 = vmatpush1.bf16.msra.mxu0 %v3486_v57 }
 0x222   : > { %2479 = vmatprep.subr.bf16.mxu0 %v3403_v42 }
 0x223   : > { %2473 = vmatpush3.bf16.msra.mxu1 %v3491_v62 }
 0x224   : > { %2475 = vmatprep.subr.bf16.mxu1 %v3499_v1 }
 0x227   : > { %2477 = vmatpush3.bf16.msra.mxu1 %v3499_v1 }
 0x228   : > { %2511 = vmatprep.subr.bf16.mxu1 %v3419_v2 }
 0x2bd   : > { %v2104_v10 = vpop.f32.mrb[0].mxu1 }
 0x2be   : > { %v779_v11 = vpop.f32.mrb[1].mxu1 }
 0x2c1   : > { %v2107_v15 = vpop.f32.mrb[2].mxu1 }
 0x2c2   : > { %v3546_v16 = vadd.f32 %v2107_v15, %v596_v13  ;;  %v789_v18 = vpop.f32.mrb[3].mxu1 }
 0x2c3   : > { %v3548_v19 = vadd.f32 %v789_v18, %v596_v13 }
 0x2c5   : > { %v2110_v20 = vpop.f32.mrb[4].mxu1 }
 0x2c6   : > { %v3550_v21 = vadd.f32 %v2110_v20, %v596_v13  ;;  %v799_v23 = vpop.f32.mrb[5].mxu1 }
 0x2c7   : > { %v3552_v25 = vadd.f32 %v799_v23, %v596_v13 }
 0x2c9   : > { %v2113_v29 = vpop.f32.mrb[6].mxu1 }
 0x2ca   : > { %v3557_v30 = vadd.f32 %v2113_v29, %v596_v13  ;;  %v809_v31 = vpop.f32.mrb[7].mxu1 }
 0x2cb   : > { %v3559_v33 = vadd.f32 %v809_v31, %v596_v13  ;;  %v3569_v31 = vrot.slane %v890_v28, %v595_v8 }
 0x2d7   : > { %v984_v41 = vpop.f32.mrb[0].mxu0 }
 0x2d8   : > { %v2607_v43 = vadd.f32 %v3561_v37, %v984_v41  ;;  %v986_v48 = vpop.f32.mrb[1].mxu0  ;;  %v780_v41 = vadd.f32 %v779_v11, %v596_v13 }
 0x2d9   : > { %v2609_v0 = vadd.f32 %v3564_v54, %v986_v48 }
 0x2da   : > { %v1892_v49 = vmul.f32 -1.442695, %v2607_v43 }
 0x2db   : > { %v990_v53 = vpop.f32.mrb[2].mxu0  ;;  %v1894_v15 = vmul.f32 -1.442695, %v2609_v0 }
 0x2dc   : > { %2768 = vpow2.f32 %v1892_v49  ;;  %v2611_v58 = vadd.f32 %v3561_v37, %v990_v53  ;;  %v992_v59 = vpop.f32.mrb[3].mxu0 }
 0x2dd   : > { %v2148_v5 = vpop.f32.mrb[8].mxu1  ;;  %v2613_v18 = vadd.f32 %v3564_v54, %v992_v59 }
 0x2de   : > { %v1893_v63 = vmul.f32 -1.442695, %v2611_v58  ;;  %v1061_v6 = vpop.f32.mrb[9].mxu1  ;;  %v1067_v48 = vadd.f32 %v2148_v5, %v3569_v31  ;;  %v785_v58 = vadd.f32 %v2104_v10, %v596_v13 }
 0x2df   : > { %v1895_v23 = vmul.f32 -1.442695, %v2613_v18  ;;  %v1062_v35 = vadd.f32 %v1061_v6, %v3569_v31 }
 0x2e0   : > { %2770 = vpow2.f32 %v1893_v63 }
 0x2e1   : > { %2772 = vpow2.f32 %v1894_v15 }
 0x2e6   : > { %v2769_v9 = vpop.eup %2768 }
 0x2e7   : > { %v1078_v20 = vadd.f32 1.0, %v2769_v9 }
 0x2e9   : > { %2774 = vrcp.f32 %v1078_v20 }
 0x2ea   : > { %v2771_v26 = vpop.eup %2770  ;;  %2776 = vpow2.f32 %v1895_v23 }
 0x2eb   : > { %v1079_v29 = vadd.f32 1.0, %v2771_v26  ;;  %v2773_v36 = vpop.eup %2772 }
 0x2ec   : > { %v1092_v47 = vadd.f32 1.0, %v2773_v36 }
 0x2ed   : > { %2778 = vrcp.f32 %v1079_v29 }
 0x2f3   : > { %v2775_v39 = vpop.eup %2774 }
 0x2f4   : > { %v1098_v43 = vmul.f32 %v2775_v39, %v1062_v35  ;;  %v2777_v44 = vpop.eup %2776 }
 0x2f5   : > { %v1093_v8 = vadd.f32 1.0, %v2777_v44 }
 0x2f6   : > { %v1100_v49 = vadd.f32 %v1098_v43, %v780_v41 }
 0x2f7   : > { %v2779_v53 = vpop.eup %2778 }
 0x2f8   : > { %v1099_v59 = vmul.f32 %v2779_v53, %v1067_v48  ;;  %2780 = vtanh.f32 %v1100_v49 }
 0x2f9   : > { %2782 = vrcp.f32 %v1092_v47 }
 0x2fa   : > { %v1101_v28 = vadd.f32 %v1099_v59, %v785_v58 }
 0x2fc   : > { %2784 = vtanh.f32 %v1101_v28 }
 0x2fd   : > { %2786 = vrcp.f32 %v1093_v8 }
 0x302   : > { %v2781_v63 = vpop.eup %2780 }
 0x303   : > { %v1104_v11 = vsub.f32 %v3477_v55, %v2781_v63  ;;  %v2783_v0 = vpop.eup %2782 }
 0x305   : > { %v1106_v6 = vmul.f32 %v2783_v0, %v1104_v11 }
 0x306   : > { %v2785_v15 = vpop.eup %2784 }
 0x307   : > { %v3574_v18 = vadd.f32 %v2781_v63, %v1106_v6  ;;  %v1105_v5 = vsub.f32 %v3502_v3, %v2785_v15  ;;  %v2787_v10 = vpop.eup %2786 }
 0x309   : > { %1110 = vst [vmem:[%s3392_s15] sm:$0xff] %v3574_v18  ;;  %1186 = vmatmul.mubr.f32.vlgmr.msra.gmra.mrb[4].mxu0 %v3574_v18  ;;  %2181 = vmatprep.mubr.f32.mxu1 %v3574_v18  ;;  %v1107_v13 = vmul.f32 %v2787_v10, %v1105_v5 }
 0x30a   : > { %1191 = vmatprep.mubr.f32.mxu0 %v3095_v40  ;;  %2481 = vmatpush1.bf16.msra.mxu0 %v3405_v50 }
 0x30b   : > { %v3583_v55 = vadd.f32 %v2785_v15, %v1107_v13  ;;  %2483 = vmatprep.subr.bf16.mxu0 %v3408_v51 }
 0x30d   : > { %1111 = vst [vmem:[%s3392_s15 + $0x8] sm:$0xff] %v3583_v55  ;;  %1192 = vmatmul.mubr.f32.gmra.mrb[6].mxu0 %v3583_v55  ;;  %2182 = vmatmul.mubr.f32.vlgmr.msra.gmra.mrb[10].mxu1 %v3583_v55 }
 0x30e   : > { %2485 = vmatpush1.bf16.msra.mxu0 %v3414_v60  ;;  %2513 = vmatpush3.bf16.msra.mxu1 %v3419_v2 }
 0x30f   : > { %2487 = vmatprep.subr.bf16.mxu0 %v3417_v61  ;;  %2515 = vmatprep.subr.bf16.mxu1 %v3430_v12 }
 0x310   : > { %1389 = vmatprep.mubr.f32.mxu0 %v3095_v40 }
 0x312   : > { %2489 = vmatpush1.bf16.msra.mxu0 %v3424_v4  ;;  %2517 = vmatpush3.bf16.msra.mxu1 %v3430_v12 }
 0x313   : > { %2491 = vmatprep.subr.bf16.mxu0 %v3427_v7  ;;  %2519 = vmatprep.subr.bf16.mxu1 %v3442_v22 }
 0x316   : > { %2493 = vmatpush1.bf16.msra.mxu0 %v3435_v14  ;;  %2521 = vmatpush3.bf16.msra.mxu1 %v3442_v22 }
 0x317   : > { %2495 = vmatprep.subr.bf16.mxu0 %v3438_v17  ;;  %2523 = vmatprep.subr.bf16.mxu1 %v3454_v32 }
 0x31a   : > { %2497 = vmatpush1.bf16.msra.mxu0 %v3447_v24  ;;  %2525 = vmatpush3.bf16.msra.mxu1 %v3454_v32 }
 0x31b   : > { %2499 = vmatprep.subr.bf16.mxu0 %v3450_v27  ;;  %2527 = vmatprep.subr.bf16.mxu1 %v3467_v45 }
 0x31e   : > { %2501 = vmatpush1.bf16.msra.mxu0 %v3459_v34  ;;  %2529 = vmatpush3.bf16.msra.mxu1 %v3467_v45 }
 0x31f   : > { %2503 = vmatprep.subr.bf16.mxu0 %v3463_v38  ;;  %2531 = vmatprep.subr.bf16.mxu1 %v3482_v56 }
 0x322   : > { %2505 = vmatpush1.bf16.msra.mxu0 %v3471_v46  ;;  %2533 = vmatpush3.bf16.msra.mxu1 %v3482_v56 }
 0x323   : > { %2507 = vmatprep.subr.bf16.mxu0 %v3475_v52  ;;  %2535 = vmatprep.subr.bf16.mxu1 %v3491_v62 }
 0x326   : > { %2509 = vmatpush1.bf16.msra.mxu0 %v3486_v57  ;;  %2537 = vmatpush3.bf16.msra.mxu1 %v3491_v62 }
 0x327   : > { %2539 = vmatprep.subr.bf16.mxu1 %v3499_v1  ;;  %2543 = vmatprep.subr.bf16.mxu0 %v3403_v42 }
 0x32a   : > { %2541 = vmatpush3.bf16.msra.mxu1 %v3499_v1 }
 0x32b   : > { %2575 = vmatprep.subr.bf16.mxu1 %v3419_v2 }
 0x3dc   : > { %v1187_v3 = vpop.f32.mrb[4].mxu0 }
 0x3dd   : > { %v2615_v9 = vadd.f32 %v3561_v37, %v1187_v3  ;;  %v1189_v20 = vpop.f32.mrb[5].mxu0 }
 0x3de   : > { %v2617_v43 = vadd.f32 %v3564_v54, %v1189_v20 }
 0x3df   : > { %v1896_v23 = vmul.f32 -1.442695, %v2615_v9 }
 0x3e0   : > { %v1193_v26 = vpop.f32.mrb[6].mxu0  ;;  %v2183_v29 = vpop.f32.mrb[10].mxu1  ;;  %v1898_v42 = vmul.f32 -1.442695, %v2617_v43 }
 0x3e1   : > { %2788 = vpow2.f32 %v1896_v23  ;;  %v2619_v35 = vadd.f32 %v3561_v37, %v1193_v26  ;;  %v1195_v36 = vpop.f32.mrb[7].mxu0  ;;  %v1264_v39 = vpop.f32.mrb[11].mxu1  ;;  %v1270_v6 = vadd.f32 %v2183_v29, %v3569_v31 }
 0x3e2   : > { %v2621_v44 = vadd.f32 %v3564_v54, %v1195_v36  ;;  %v1265_v8 = vadd.f32 %v1264_v39, %v3569_v31 }
 0x3e3   : > { %v1897_v41 = vmul.f32 -1.442695, %v2619_v35 }
 0x3e4   : > { %v1899_v49 = vmul.f32 -1.442695, %v2621_v44 }
 0x3e5   : > { %2790 = vpow2.f32 %v1897_v41 }
 0x3e6   : > { %2792 = vpow2.f32 %v1898_v42 }
 0x3eb   : > { %v2789_v47 = vpop.eup %2788 }
 0x3ec   : > { %v1281_v48 = vadd.f32 1.0, %v2789_v47 }
 0x3ee   : > { %2794 = vrcp.f32 %v1281_v48 }
 0x3ef   : > { %v2791_v53 = vpop.eup %2790  ;;  %2796 = vpow2.f32 %v1899_v49 }
 0x3f0   : > { %v1282_v58 = vadd.f32 1.0, %v2791_v53  ;;  %v2793_v59 = vpop.eup %2792 }
 0x3f1   : > { %v1295_v0 = vadd.f32 1.0, %v2793_v59 }
 0x3f2   : > { %2798 = vrcp.f32 %v1282_v58 }
 0x3f8   : > { %v2795_v28 = vpop.eup %2794 }
 0x3f9   : > { %v1301_v63 = vmul.f32 %v2795_v28, %v1265_v8  ;;  %v2797_v11 = vpop.eup %2796 }
 0x3fa   : > { %v1296_v3 = vadd.f32 1.0, %v2797_v11 }
 0x3fb   : > { %v1303_v15 = vadd.f32 %v1301_v63, %v3548_v19 }
 0x3fc   : > { %v2799_v5 = vpop.eup %2798 }
 0x3fd   : > { %v1302_v10 = vmul.f32 %v2799_v5, %v1270_v6  ;;  %2800 = vtanh.f32 %v1303_v15 }
 0x3fe   : > { %2802 = vrcp.f32 %v1295_v0 }
 0x3ff   : > { %v1304_v13 = vadd.f32 %v1302_v10, %v3546_v16 }
 0x401   : > { %2804 = vtanh.f32 %v1304_v13 }
 0x402   : > { %2806 = vrcp.f32 %v1296_v3 }
 0x407   : > { %v2801_v9 = vpop.eup %2800 }
 0x408   : > { %v1307_v20 = vsub.f32 %v3574_v18, %v2801_v9  ;;  %v2803_v23 = vpop.eup %2802 }
 0x40a   : > { %v1309_v26 = vmul.f32 %v2803_v23, %v1307_v20 }
 0x40b   : > { %v2805_v35 = vpop.eup %2804 }
 0x40c   : > { %v3630_v29 = vadd.f32 %v2801_v9, %v1309_v26  ;;  %v1308_v19 = vsub.f32 %v3583_v55, %v2805_v35  ;;  %v2807_v36 = vpop.eup %2806 }
 0x40e   : > { %1900 = vst [vmem:[%s3392_s15 + $0x10] sm:$0xff] %v3630_v29  ;;  %1390 = vmatmul.mubr.f32.vlgmr.msra.gmra.mrb[8].mxu0 %v3630_v29  ;;  %2216 = vmatprep.mubr.f32.mxu1 %v3630_v29  ;;  %v1310_v16 = vmul.f32 %v2807_v36, %v1308_v19 }
 0x40f   : > { %1395 = vmatprep.mubr.f32.mxu0 %v3095_v40  ;;  %2545 = vmatpush1.bf16.msra.mxu0 %v3405_v50 }
 0x410   : > { %v3639_v18 = vadd.f32 %v2805_v35, %v1310_v16  ;;  %2547 = vmatprep.subr.bf16.mxu0 %v3408_v51 }
 0x412   : > { %1901 = vst [vmem:[%s3392_s15 + $0x18] sm:$0xff] %v3639_v18  ;;  %1396 = vmatmul.mubr.f32.gmra.mrb[10].mxu0 %v3639_v18  ;;  %2217 = vmatmul.mubr.f32.vlgmr.msra.gmra.mrb[12].mxu1 %v3639_v18 }
 0x413   : > { %2549 = vmatpush1.bf16.msra.mxu0 %v3414_v60  ;;  %2577 = vmatpush3.bf16.msra.mxu1 %v3419_v2 }
 0x414   : > { %2551 = vmatprep.subr.bf16.mxu0 %v3417_v61  ;;  %2579 = vmatprep.subr.bf16.mxu1 %v3430_v12 }
 0x415   : > { %1593 = vmatprep.mubr.f32.mxu0 %v3095_v40 }
 0x417   : > { %2553 = vmatpush1.bf16.msra.mxu0 %v3424_v4  ;;  %2581 = vmatpush3.bf16.msra.mxu1 %v3430_v12 }
 0x418   : > { %2555 = vmatprep.subr.bf16.mxu0 %v3427_v7  ;;  %2583 = vmatprep.subr.bf16.mxu1 %v3442_v22 }
 0x41b   : > { %2557 = vmatpush1.bf16.msra.mxu0 %v3435_v14  ;;  %2585 = vmatpush3.bf16.msra.mxu1 %v3442_v22 }
 0x41c   : > { %2559 = vmatprep.subr.bf16.mxu0 %v3438_v17  ;;  %2587 = vmatprep.subr.bf16.mxu1 %v3454_v32 }
 0x41f   : > { %2561 = vmatpush1.bf16.msra.mxu0 %v3447_v24  ;;  %2589 = vmatpush3.bf16.msra.mxu1 %v3454_v32 }
 0x420   : > { %2563 = vmatprep.subr.bf16.mxu0 %v3450_v27  ;;  %2591 = vmatprep.subr.bf16.mxu1 %v3467_v45 }
 0x423   : > { %2565 = vmatpush1.bf16.msra.mxu0 %v3459_v34  ;;  %2593 = vmatpush3.bf16.msra.mxu1 %v3467_v45 }
 0x424   : > { %2567 = vmatprep.subr.bf16.mxu0 %v3463_v38  ;;  %2595 = vmatprep.subr.bf16.mxu1 %v3482_v56 }
 0x427   : > { %2569 = vmatpush1.bf16.msra.mxu0 %v3471_v46  ;;  %2597 = vmatpush3.bf16.msra.mxu1 %v3482_v56 }
 0x428   : > { %2571 = vmatprep.subr.bf16.mxu0 %v3475_v52  ;;  %2599 = vmatprep.subr.bf16.mxu1 %v3491_v62 }
 0x42b   : > { %2573 = vmatpush1.bf16.msra.mxu0 %v3486_v57  ;;  %2601 = vmatpush3.bf16.msra.mxu1 %v3491_v62 }
 0x42c   : > { %2603 = vmatprep.subr.bf16.mxu1 %v3499_v1 }
 0x42f   : > { %2605 = vmatpush3.bf16.msra.mxu1 %v3499_v1 }
 0x4e1   : > { %v1391_v50 = vpop.f32.mrb[8].mxu0 }
 0x4e2   : > { %v2623_v51 = vadd.f32 %v3561_v37, %v1391_v50  ;;  %v1393_v60 = vpop.f32.mrb[9].mxu0 }
 0x4e3   : > { %v2625_v22 = vadd.f32 %v3564_v54, %v1393_v60 }
 0x4e4   : > { %v1902_v61 = vmul.f32 -1.442695, %v2623_v51 }
 0x4e5   : > { %v1397_v2 = vpop.f32.mrb[10].mxu0  ;;  %v2218_v4 = vpop.f32.mrb[12].mxu1  ;;  %v1904_v24 = vmul.f32 -1.442695, %v2625_v22 }
 0x4e6   : > { %2808 = vpow2.f32 %v1902_v61  ;;  %v2627_v7 = vadd.f32 %v3561_v37, %v1397_v2  ;;  %v1399_v12 = vpop.f32.mrb[11].mxu0  ;;  %v1468_v14 = vpop.f32.mrb[13].mxu1  ;;  %v1474_v39 = vadd.f32 %v2218_v4, %v3569_v31 }
 0x4e7   : > { %v2629_v27 = vadd.f32 %v3564_v54, %v1399_v12  ;;  %v1469_v56 = vadd.f32 %v1468_v14, %v3569_v31 }
 0x4e8   : > { %v1903_v17 = vmul.f32 -1.442695, %v2627_v7 }
 0x4e9   : > { %v1905_v38 = vmul.f32 -1.442695, %v2629_v27 }
 0x4ea   : > { %2810 = vpow2.f32 %v1903_v17 }
 0x4eb   : > { %2812 = vpow2.f32 %v1904_v24 }
 0x4f0   : > { %v2809_v32 = vpop.eup %2808 }
 0x4f1   : > { %v1485_v34 = vadd.f32 1.0, %v2809_v32 }
 0x4f3   : > { %2814 = vrcp.f32 %v1485_v34 }
 0x4f4   : > { %v2811_v45 = vpop.eup %2810  ;;  %2816 = vpow2.f32 %v1905_v38 }
 0x4f5   : > { %v1486_v46 = vadd.f32 1.0, %v2811_v45  ;;  %v2813_v52 = vpop.eup %2812 }
 0x4f6   : > { %v1499_v55 = vadd.f32 1.0, %v2813_v52 }
 0x4f7   : > { %2818 = vrcp.f32 %v1486_v46 }
 0x4fd   : > { %v2815_v57 = vpop.eup %2814 }
 0x4fe   : > { %v1505_v62 = vmul.f32 %v2815_v57, %v1469_v56  ;;  %v2817_v1 = vpop.eup %2816 }
 0x4ff   : > { %v1500_v47 = vadd.f32 1.0, %v2817_v1 }
 0x500   : > { %v1507_v41 = vadd.f32 %v1505_v62, %v3552_v25 }
 0x501   : > { %v2819_v43 = vpop.eup %2818 }
 0x502   : > { %v1506_v42 = vmul.f32 %v2819_v43, %v1474_v39  ;;  %2820 = vtanh.f32 %v1507_v41 }
 0x503   : > { %2822 = vrcp.f32 %v1499_v55 }
 0x504   : > { %v1508_v44 = vadd.f32 %v1506_v42, %v3550_v21 }
 0x506   : > { %2824 = vtanh.f32 %v1508_v44 }
 0x507   : > { %2826 = vrcp.f32 %v1500_v47 }
 0x50c   : > { %v2821_v48 = vpop.eup %2820 }
 0x50d   : > { %v1511_v49 = vsub.f32 %v3630_v29, %v2821_v48  ;;  %v2823_v53 = vpop.eup %2822 }
 0x50f   : > { %v1513_v58 = vmul.f32 %v2823_v53, %v1511_v49 }
 0x510   : > { %v2825_v59 = vpop.eup %2824 }
 0x511   : > { %v1515_v8 = vadd.f32 %v2821_v48, %v1513_v58  ;;  %v1512_v25 = vsub.f32 %v3639_v18, %v2825_v59  ;;  %v2827_v28 = vpop.eup %2826 }
 0x513   : > { %1906 = vst [vmem:[%s3392_s15 + $0x20] sm:$0xff] %v1515_v8  ;;  %1594 = vmatmul.mubr.f32.vlgmr.msra.gmra.mrb[12].mxu0 %v1515_v8  ;;  %2251 = vmatprep.mubr.f32.mxu1 %v1515_v8  ;;  %v1514_v63 = vmul.f32 %v2827_v28, %v1512_v25 }
 0x514   : > { %1599 = vmatprep.mubr.f32.mxu0 %v3095_v40 }
 0x515   : > { %v1516_v21 = vadd.f32 %v2825_v59, %v1514_v63 }
 0x517   : > { %1907 = vst [vmem:[%s3392_s15 + $0x28] sm:$0xff] %v1516_v21  ;;  %1600 = vmatmul.mubr.f32.gmra.mrb[14].mxu0 %v1516_v21  ;;  %2252 = vmatmul.mubr.f32.vlgmr.msra.gmra.mrb[14].mxu1 %v1516_v21 }
 0x5e6   : > { %v1595_v11 = vpop.f32.mrb[12].mxu0 }
 0x5e7   : > { %v2631_v0 = vadd.f32 %v3561_v37, %v1595_v11  ;;  %v1597_v6 = vpop.f32.mrb[13].mxu0 }
 0x5e8   : > { %v2633_v23 = vadd.f32 %v3564_v54, %v1597_v6 }
 0x5e9   : > { %v1908_v15 = vmul.f32 -1.442695, %v2631_v0 }
 0x5ea   : > { %v1601_v5 = vpop.f32.mrb[14].mxu0  ;;  %v2253_v10 = vpop.f32.mrb[14].mxu1  ;;  %v1910_v40 = vmul.f32 -1.442695, %v2633_v23 }
 0x5eb   : > { %2828 = vpow2.f32 %v1908_v15  ;;  %v2635_v13 = vadd.f32 %v3561_v37, %v1601_v5  ;;  %v1603_v3 = vpop.f32.mrb[15].mxu0  ;;  %v1672_v9 = vpop.f32.mrb[15].mxu1  ;;  %v1678_v2 = vadd.f32 %v2253_v10, %v3569_v31 }
 0x5ec   : > { %v2637_v26 = vadd.f32 %v3564_v54, %v1603_v3  ;;  %v1673_v37 = vadd.f32 %v1672_v9, %v3569_v31 }
 0x5ed   : > { %v1909_v20 = vmul.f32 -1.442695, %v2635_v13 }
 0x5ee   : > { %v1911_v19 = vmul.f32 -1.442695, %v2637_v26 }
 0x5ef   : > { %2830 = vpow2.f32 %v1909_v20 }
 0x5f0   : > { %2832 = vpow2.f32 %v1910_v40 }
 0x5f5   : > { %v2829_v35 = vpop.eup %2828 }
 0x5f6   : > { %v1689_v29 = vadd.f32 1.0, %v2829_v35 }
 0x5f8   : > { %2834 = vrcp.f32 %v1689_v29 }
 0x5f9   : > { %v2831_v36 = vpop.eup %2830  ;;  %2836 = vpow2.f32 %v1911_v19 }
 0x5fa   : > { %v1690_v16 = vadd.f32 1.0, %v2831_v36  ;;  %v2833_v18 = vpop.eup %2832 }
 0x5fb   : > { %v1703_v61 = vadd.f32 1.0, %v2833_v18 }
 0x5fc   : > { %2838 = vrcp.f32 %v1690_v16 }
 0x602   : > { %v2835_v50 = vpop.eup %2834 }
 0x603   : > { %v1709_v51 = vmul.f32 %v2835_v50, %v1673_v37  ;;  %v2837_v60 = vpop.eup %2836 }
 0x604   : > { %v1704_v14 = vadd.f32 1.0, %v2837_v60 }
 0x605   : > { %v1711_v54 = vadd.f32 %v1709_v51, %v3559_v33 }
 0x606   : > { %v2839_v4 = vpop.eup %2838 }
 0x607   : > { %v1710_v7 = vmul.f32 %v2839_v4, %v1678_v2  ;;  %2840 = vtanh.f32 %v1711_v54 }
 0x608   : > { %2842 = vrcp.f32 %v1703_v61 }
 0x609   : > { %v1712_v12 = vadd.f32 %v1710_v7, %v3557_v30 }
 0x60b   : > { %2844 = vtanh.f32 %v1712_v12 }
 0x60c   : > { %2846 = vrcp.f32 %v1704_v14 }
 0x611   : > { %v2841_v17 = vpop.eup %2840 }
 0x612   : > { %v1715_v22 = vsub.f32 %v1515_v8, %v2841_v17  ;;  %v2843_v24 = vpop.eup %2842 }
 0x614   : > { %v1717_v31 = vmul.f32 %v2843_v24, %v1715_v22 }
 0x615   : > { %v2845_v27 = vpop.eup %2844 }
 0x616   : > { %v1716_v33 = vsub.f32 %v1516_v21, %v2845_v27  ;;  %v1719_v32 = vadd.f32 %v2841_v17, %v1717_v31  ;;  %v2847_v34 = vpop.eup %2846 }
 0x618   : > { %v1718_v38 = vmul.f32 %v2847_v34, %v1716_v33  ;;  %1912 = vst [vmem:[%s3392_s15 + $0x30] sm:$0xff] %v1719_v32  ;;  %1724 = vst [vmem:[#allocation2] sm:$0xff] %v1719_v32 }
 0x61a   : > { %v1720_v30 = vadd.f32 %v2845_v27, %v1718_v38 }
 0x61c   : > { %1913 = vst [vmem:[%s3392_s15 + $0x38] sm:$0xff] %v1720_v30  ;;  %1725 = vst [vmem:[#allocation2 + $0x8] sm:$0xff] %v1720_v30 }
 0x61d   : > { %3003 = shalt.err (!%p3000_p2)
}
 0x61e   : > { %s3004_s14 = scalar_lea.hbm %s3702_s0, 1024  ;;  %s3008_s13 = scalar_lea.hbm %s3806_s8, 2048 }
 0x61f   : > { %p3005_p11 = scmp.ne.s32.totalorder %s3702_s0, %s3004_s14  ;;  %p3009_p8 = scmp.lt.u32.totalorder %s3702_s0, %s3806_s8 }
 0x620   : > { %p3010_p12 = scmp.lt.u32.totalorder %s3008_s13, %s3004_s14  ;;  %p3012_p5 = scmp.lt.u32.totalorder %s3004_s14, %s3702_s0 }
 0x621   : > { %p3006_p4 = pnand %p3005_p11, %p3314_p9 }
 0x622   : > { %p3011_p0 = por %p3010_p12, %p3009_p8 }
 0x623   : > { %p3007_p6 = pneg %p3006_p4 }
 0x624   : > { %p3013_p10 = por %p3012_p5, %p3011_p0 }
 0x626   : > { %p3014_p13 = pnand %p3013_p10, %p3007_p6 }
 0x628   : > { %3017 = shalt.err (!%p3014_p13)
}
 0x629   : > { %s3097_s22 = smov 128   ;;  %s3098_s12 = smov 8  }
 0x62a   : > { %2672 = dma.vmem_to_hbm [thread:$0]  (%p3314_p9), %s3704_s2, 1024, %s3702_s0, %s3709_s30, %s3097_s22, %s3097_s22, %s3098_s12  }
 0x62b PF: > { %s3807_s26 = sld [smem:[#allocation19_spill]]  ;;  %s3808_s16 = sld [smem:[#allocation20_spill]] }
 0x62c   : > { %p3810_p3 = scmp.ge.s32.totalorder %s3084_s10, 2 }
 0x631   : > { %s1757_s20 = sand.u32 1, %s3807_s26   ;;  %p3809_p1 = scmp.ne.s32.totalorder %s3808_s16, 0 }
 0x632   : > { %s1758_s4 = scalar_lea.sflag [#allocation6], %s1757_s20 }
 0x633   : > { %p2692_p7 = pnand %p3810_p3, %p3809_p1 }
 0x635   : > { %3059 = dma.done.wait (!%p2692_p7), %s1758_s4, 1024  }
 0x636   : > { %3061 = vsyncadd (!%p2692_p7), %s1758_s4, 4294966272  ;;  %s26_s10 = sadd.s32 1, %s3084_s10   ;;  %s3811_s27 = smov %s3068_s28 }
 0x637   : > { %p23_p2 = scmp.ge.s32.totalorder %s26_s10, 4   ;;  %s3812_s28 = smov %s3072_s29 }
 0x638   : > { %s3813_s29 = smov %s3324_s17  ;;  %s3814_s30 = smov %s3080_s9 }
 0x639   : > { %s3815_s9 = smov %s3817_s18  ;;  %25 = sbr.rel (!%p23_p2) target bundleno = 13 (0xd), region = 126 }
 0x640   :  { %1763 = vsyncpa [#allocation5], 1 }
 0x641   :  { %1765 = vsyncpa [#allocation5 + $0x1], 1 }
 0x642   :  { %1766 = vsyncpa [#allocation8], 1 }
 0x643   :  { %1768 = vsyncpa [#allocation8 + $0x1], 1 }
 0x644   :  { %1769 = vsyncpa [#allocation11], 1 }
 0x645   :  { %1770 = vsyncpa [#allocation6], 1 }
 0x646   :  { %1772 = vsyncpa [#allocation6 + $0x1], 1 }

</bundles_post_ra>
